<compile_context>
chip_gen: v7x
topology: tpu7x:2x2x1
jax: 0.10.0
libtpu: 0.0.40
codegen_flags: <defaults>
</compile_context>

<pallas_src>
import functools

import jax
import jax.numpy as jnp
from jax.experimental import pallas as pl
from jax.experimental.pallas import tpu as pltpu

K_IN = 28 * 28      # 784 (flattened image)
H1, H2, H3 = 512, 512, 256
H4 = 64
H4_PAD = 128        # lane-aligned layer-4 width (zero-padded)
N_OUT = 10
N_PAD = 128         # lane-aligned final width (unmasked, lane-dense stores)


def _cdiv(a, b):
    return -(-a // b)


def _round_up(a, m):
    return _cdiv(a, m) * m


def mlp_kernel(x_ref,
               w1_ref, b1_ref,
               w2_ref, b2_ref,
               w3_ref, b3_ref,
               w4_ref, b4_ref,
               w5_ref, b5_ref,
               out_ref):
    """Whole 5-layer MLP for one batch tile; all weights resident in VMEM.

    Matmul operands use the weights' dtype (bf16 by default), accumulation is
    f32 on the MXU (preferred_element_type); bias add and ReLU are in f32.
    """
    cdt = w1_ref.dtype   # compute dtype of the matmul operands

    def layer(h, w_ref, b_ref, relu=True):
        acc = jnp.dot(h, w_ref[...], preferred_element_type=jnp.float32)
        acc = acc + b_ref[...]
        if relu:
            acc = jnp.maximum(acc, 0.0)
        return acc

    # In-kernel f32 -> bf16 cast of the input tile (VPU work, hidden by MXU).
    h = layer(x_ref[...].astype(cdt), w1_ref, b1_ref).astype(cdt)
    h = layer(h, w2_ref, b2_ref).astype(cdt)
    h = layer(h, w3_ref, b3_ref).astype(cdt)
    h = layer(h, w4_ref, b4_ref).astype(cdt)
    out_ref[...] = layer(h, w5_ref, b5_ref, relu=False).astype(out_ref.dtype)


def prepare_params(params, compute_dtype=jnp.bfloat16):
    """One-time pad + cast of the parameters (call once, reuse every step).

    Weights are cast to `compute_dtype` (bf16 default; pass jnp.float32 for an
    exact-f32 fallback path), biases stay f32 as (1, N) rows.  Layer-4 output
    and layer-5 input/output are zero-padded to 128 lanes so the tail matmuls
    and the final store are lane-dense.
    """
    (w1, b1), (w2, b2), (w3, b3), (w4, b4), (w5, b5) = params

    def as_row(b):
        return jnp.asarray(b, jnp.float32).reshape(1, -1)

    w4p = jnp.pad(jnp.asarray(w4), ((0, 0), (0, H4_PAD - H4)))
    b4p = jnp.pad(as_row(b4), ((0, 0), (0, H4_PAD - H4)))
    w5p = jnp.pad(jnp.asarray(w5), ((0, H4_PAD - H4), (0, N_PAD - N_OUT)))
    b5p = jnp.pad(as_row(b5), ((0, 0), (0, N_PAD - N_OUT)))

    c = lambda w: jnp.asarray(w).astype(compute_dtype)
    return (c(w1), as_row(b1),
            c(w2), as_row(b2),
            c(w3), as_row(b3),
            c(w4p), b4p,
            c(w5p), b5p)


def _select_tile(batch, batch_tile, min_grid_steps):
    """Balanced, 16-row-aligned batch tile with core-aware grid sizing."""
    n_steps = _cdiv(batch, batch_tile)
    # Keep >= min_grid_steps "parallel" grid steps (feeds both v7x
    # TensorCores) whenever each step still gets >= 16 real rows.
    if batch >= 16 * min_grid_steps:
        n_steps = max(n_steps, min_grid_steps)
    tile = _round_up(_cdiv(batch, n_steps), 16)
    padded = _round_up(batch, tile)
    return tile, padded


@functools.partial(jax.jit, static_argnames=("batch_tile", "min_grid_steps"))
def neural_network_forward(x, prepared_params, batch_tile=512,
                           min_grid_steps=2):
    """x: (B, 28, 28) float32 -> logits (B, 10) float32.

    `prepared_params` must come from prepare_params().  batch_tile=512
    amortizes per-grid-step overhead on v5e/v6e; min_grid_steps=2 keeps both
    v7x TensorCores busy (harmless elsewhere; set to 1 to force single tile).
    """
    B = x.shape[0]
    # Flatten only (a view) — no wrapper cast/pad pass over the activations.
    x2d = x.reshape(B, K_IN)

    tile, Bp = _select_tile(B, batch_tile, min_grid_steps)
    if Bp != B:
        x2d = jnp.pad(x2d, ((0, Bp - B), (0, 0)))

    def full_spec(arr):
        # Entire parameter resident in VMEM; constant block index => fetched
        # exactly once for the whole grid.
        return pl.BlockSpec(arr.shape, lambda i: (0, 0))

    out = pl.pallas_call(
        mlp_kernel,
        out_shape=jax.ShapeDtypeStruct((Bp, N_PAD), jnp.float32),
        grid_spec=pltpu.PrefetchScalarGridSpec(
            num_scalar_prefetch=0,
            grid=(Bp // tile,),
            in_specs=[pl.BlockSpec((tile, K_IN), lambda i: (i, 0))]
                     + [full_spec(p) for p in prepared_params],
            out_specs=pl.BlockSpec((tile, N_PAD), lambda i: (i, 0)),
        ),
        compiler_params=pltpu.CompilerParams(
            dimension_semantics=("parallel",),
            # Footprint is ~7-14 MB even at tile=1024; 48 MiB leaves headroom
            # and is safe on v7x's 64 MiB VMEM.
            vmem_limit_bytes=48 * 1024 * 1024,
        ),
    )(x2d, *prepared_params)

    # Drop batch padding and the zero-padded output lanes.
    return out[:B, :N_OUT]


def init_params(key):
    """Deterministic init mimicking PyTorch's default Linear init
    (uniform(-1/sqrt(fan_in), 1/sqrt(fan_in)) for weights and biases)."""
    dims = [(K_IN, H1), (H1, H2), (H2, H3), (H3, H4), (H4, N_OUT)]
    params = []
    for fan_in, fan_out in dims:
        key, kw, kb = jax.random.split(key, 3)
        bound = 1.0 / (fan_in ** 0.5)
        w = jax.random.uniform(kw, (fan_in, fan_out), jnp.float32,
                               minval=-bound, maxval=bound)
        b = jax.random.uniform(kb, (1, fan_out), jnp.float32,
                               minval=-bound, maxval=bound)
        params.append((w, b))
    return params


def reference_forward(x, params, compute_dtype=jnp.float32):
    """Pure-JAX reference.  With compute_dtype=bf16 it mirrors the kernel's
    mixed-precision path (bf16 operands, f32 accumulation, f32 bias/ReLU)."""
    h = x.reshape(x.shape[0], -1)
    for i, (w, b) in enumerate(params):
        h = jnp.dot(h.astype(compute_dtype), w.astype(compute_dtype),
                    preferred_element_type=jnp.float32) + b.reshape(1, -1)
        if i < len(params) - 1:
            h = jnp.maximum(h, 0.0)
    return h


if __name__ == "__main__":
    key = jax.random.PRNGKey(0)
    kp, kx = jax.random.split(key)

    params = init_params(kp)
    prepared = prepare_params(params)          # one-time pad + bf16 cast
    x = jax.random.normal(kx, (2, 28, 28), dtype=jnp.float32)   # batch = 2

    logits = neural_network_forward(x, prepared)
    jax.block_until_ready(logits)
    assert logits.shape == (2, N_OUT), logits.shape

    # Tight check against a reference running the same bf16/f32 mixed precision.
    ref_bf16 = reference_forward(x, params, compute_dtype=jnp.bfloat16)
    assert jnp.allclose(logits, ref_bf16, atol=5e-3, rtol=5e-3), \
        "mismatch vs bf16 reference"

    # Loose check against the full-f32 (PyTorch-equivalent) reference; bf16
    # matmul operands are a documented mixed-precision deviation (use
    # prepare_params(..., compute_dtype=jnp.float32) for an exact-f32 path).
    ref_f32 = reference_forward(x, params, compute_dtype=jnp.float32)
    assert jnp.allclose(logits, ref_f32, atol=5e-2, rtol=5e-2), \
        "mismatch vs f32 reference"

    print("KERNEL_OK")
</pallas_src>

<mosaic_0001>
module attributes {stable_mosaic.version = 11 : i64} {
  func.func @mlp_kernel(%arg0: i32, %arg1: memref<16x784xf32, #tpu.memory_space<vmem>>, %arg2: memref<784x512xbf16, #tpu.memory_space<vmem>>, %arg3: memref<1x512xf32, #tpu.memory_space<vmem>>, %arg4: memref<512x512xbf16, #tpu.memory_space<vmem>>, %arg5: memref<1x512xf32, #tpu.memory_space<vmem>>, %arg6: memref<512x256xbf16, #tpu.memory_space<vmem>>, %arg7: memref<1x256xf32, #tpu.memory_space<vmem>>, %arg8: memref<256x128xbf16, #tpu.memory_space<vmem>>, %arg9: memref<1x128xf32, #tpu.memory_space<vmem>>, %arg10: memref<128x128xbf16, #tpu.memory_space<vmem>>, %arg11: memref<1x128xf32, #tpu.memory_space<vmem>>, %arg12: memref<16x128xf32, #tpu.memory_space<vmem>>) attributes {dimension_semantics = [#tpu.dimension_semantics<parallel>], iteration_bounds = array<i64: 1>, scalar_prefetch = 0 : i64, scratch_operands = 0 : i64, tpu.core_type = #tpu.core_type<tc>, window_params = [{transform_indices = @transform_0, window_bounds = array<i64: 16, 784>}, {pipeline_mode = #tpu.pipeline_mode<synchronous>, transform_indices = @transform_1, window_bounds = array<i64: 784, 512>}, {pipeline_mode = #tpu.pipeline_mode<synchronous>, transform_indices = @transform_2, window_bounds = array<i64: 1, 512>}, {pipeline_mode = #tpu.pipeline_mode<synchronous>, transform_indices = @transform_3, window_bounds = array<i64: 512, 512>}, {pipeline_mode = #tpu.pipeline_mode<synchronous>, transform_indices = @transform_4, window_bounds = array<i64: 1, 512>}, {pipeline_mode = #tpu.pipeline_mode<synchronous>, transform_indices = @transform_5, window_bounds = array<i64: 512, 256>}, {pipeline_mode = #tpu.pipeline_mode<synchronous>, transform_indices = @transform_6, window_bounds = array<i64: 1, 256>}, {pipeline_mode = #tpu.pipeline_mode<synchronous>, transform_indices = @transform_7, window_bounds = array<i64: 256, 128>}, {pipeline_mode = #tpu.pipeline_mode<synchronous>, transform_indices = @transform_8, window_bounds = array<i64: 1, 128>}, {pipeline_mode = #tpu.pipeline_mode<synchronous>, transform_indices = @transform_9, window_bounds = array<i64: 128, 128>}, {pipeline_mode = #tpu.pipeline_mode<synchronous>, transform_indices = @transform_10, window_bounds = array<i64: 1, 128>}, {transform_indices = @transform_11, window_bounds = array<i64: 16, 128>}]} {
    %c0 = arith.constant 0 : index
    %c0_0 = arith.constant 0 : index
    %0 = vector.load %arg1[%c0, %c0_0] : memref<16x784xf32, #tpu.memory_space<vmem>>, vector<16x784xf32>
    %1 = arith.truncf %0 : vector<16x784xf32> to vector<16x784xbf16>
    %c0_1 = arith.constant 0 : index
    %c0_2 = arith.constant 0 : index
    %2 = vector.load %arg2[%c0_1, %c0_2] : memref<784x512xbf16, #tpu.memory_space<vmem>>, vector<784x512xbf16>
    %cst = arith.constant dense<0.000000e+00> : vector<16x512xf32>
    %3 = tpu.matmul %1, %2, %cst {dimension_numbers = #tpu.dot_dimension_numbers<[1], [0], [0], [1], [0, 0, 1, 1], [], []>} : vector<16x784xbf16>, vector<784x512xbf16>, vector<16x512xf32> -> vector<16x512xf32>
    %c0_3 = arith.constant 0 : index
    %c0_4 = arith.constant 0 : index
    %4 = vector.load %arg3[%c0_3, %c0_4] : memref<1x512xf32, #tpu.memory_space<vmem>>, vector<1x512xf32>
    %5 = vector.broadcast %4 : vector<1x512xf32> to vector<16x512xf32>
    %6 = arith.addf %3, %5 : vector<16x512xf32>
    %cst_5 = arith.constant 0.000000e+00 : f32
    %7 = vector.broadcast %cst_5 : f32 to vector<16x512xf32>
    %8 = arith.maximumf %6, %7 : vector<16x512xf32>
    %9 = arith.truncf %8 : vector<16x512xf32> to vector<16x512xbf16>
    %c0_6 = arith.constant 0 : index
    %c0_7 = arith.constant 0 : index
    %10 = vector.load %arg4[%c0_6, %c0_7] : memref<512x512xbf16, #tpu.memory_space<vmem>>, vector<512x512xbf16>
    %cst_8 = arith.constant dense<0.000000e+00> : vector<16x512xf32>
    %11 = tpu.matmul %9, %10, %cst_8 {dimension_numbers = #tpu.dot_dimension_numbers<[1], [0], [0], [1], [0, 0, 1, 1], [], []>} : vector<16x512xbf16>, vector<512x512xbf16>, vector<16x512xf32> -> vector<16x512xf32>
    %c0_9 = arith.constant 0 : index
    %c0_10 = arith.constant 0 : index
    %12 = vector.load %arg5[%c0_9, %c0_10] : memref<1x512xf32, #tpu.memory_space<vmem>>, vector<1x512xf32>
    %13 = vector.broadcast %12 : vector<1x512xf32> to vector<16x512xf32>
    %14 = arith.addf %11, %13 : vector<16x512xf32>
    %cst_11 = arith.constant 0.000000e+00 : f32
    %15 = vector.broadcast %cst_11 : f32 to vector<16x512xf32>
    %16 = arith.maximumf %14, %15 : vector<16x512xf32>
    %17 = arith.truncf %16 : vector<16x512xf32> to vector<16x512xbf16>
    %c0_12 = arith.constant 0 : index
    %c0_13 = arith.constant 0 : index
    %18 = vector.load %arg6[%c0_12, %c0_13] : memref<512x256xbf16, #tpu.memory_space<vmem>>, vector<512x256xbf16>
    %cst_14 = arith.constant dense<0.000000e+00> : vector<16x256xf32>
    %19 = tpu.matmul %17, %18, %cst_14 {dimension_numbers = #tpu.dot_dimension_numbers<[1], [0], [0], [1], [0, 0, 1, 1], [], []>} : vector<16x512xbf16>, vector<512x256xbf16>, vector<16x256xf32> -> vector<16x256xf32>
    %c0_15 = arith.constant 0 : index
    %c0_16 = arith.constant 0 : index
    %20 = vector.load %arg7[%c0_15, %c0_16] : memref<1x256xf32, #tpu.memory_space<vmem>>, vector<1x256xf32>
    %21 = vector.broadcast %20 : vector<1x256xf32> to vector<16x256xf32>
    %22 = arith.addf %19, %21 : vector<16x256xf32>
    %cst_17 = arith.constant 0.000000e+00 : f32
    %23 = vector.broadcast %cst_17 : f32 to vector<16x256xf32>
    %24 = arith.maximumf %22, %23 : vector<16x256xf32>
    %25 = arith.truncf %24 : vector<16x256xf32> to vector<16x256xbf16>
    %c0_18 = arith.constant 0 : index
    %c0_19 = arith.constant 0 : index
    %26 = vector.load %arg8[%c0_18, %c0_19] : memref<256x128xbf16, #tpu.memory_space<vmem>>, vector<256x128xbf16>
    %cst_20 = arith.constant dense<0.000000e+00> : vector<16x128xf32>
    %27 = tpu.matmul %25, %26, %cst_20 {dimension_numbers = #tpu.dot_dimension_numbers<[1], [0], [0], [1], [0, 0, 1, 1], [], []>} : vector<16x256xbf16>, vector<256x128xbf16>, vector<16x128xf32> -> vector<16x128xf32>
    %c0_21 = arith.constant 0 : index
    %c0_22 = arith.constant 0 : index
    %28 = vector.load %arg9[%c0_21, %c0_22] : memref<1x128xf32, #tpu.memory_space<vmem>>, vector<1x128xf32>
    %29 = vector.broadcast %28 : vector<1x128xf32> to vector<16x128xf32>
    %30 = arith.addf %27, %29 : vector<16x128xf32>
    %cst_23 = arith.constant 0.000000e+00 : f32
    %31 = vector.broadcast %cst_23 : f32 to vector<16x128xf32>
    %32 = arith.maximumf %30, %31 : vector<16x128xf32>
    %33 = arith.truncf %32 : vector<16x128xf32> to vector<16x128xbf16>
    %c0_24 = arith.constant 0 : index
    %c0_25 = arith.constant 0 : index
    %34 = vector.load %arg10[%c0_24, %c0_25] : memref<128x128xbf16, #tpu.memory_space<vmem>>, vector<128x128xbf16>
    %cst_26 = arith.constant dense<0.000000e+00> : vector<16x128xf32>
    %35 = tpu.matmul %33, %34, %cst_26 {dimension_numbers = #tpu.dot_dimension_numbers<[1], [0], [0], [1], [0, 0, 1, 1], [], []>} : vector<16x128xbf16>, vector<128x128xbf16>, vector<16x128xf32> -> vector<16x128xf32>
    %c0_27 = arith.constant 0 : index
    %c0_28 = arith.constant 0 : index
    %36 = vector.load %arg11[%c0_27, %c0_28] : memref<1x128xf32, #tpu.memory_space<vmem>>, vector<1x128xf32>
    %37 = vector.broadcast %36 : vector<1x128xf32> to vector<16x128xf32>
    %38 = arith.addf %35, %37 : vector<16x128xf32>
    %c0_29 = arith.constant 0 : index
    %c0_30 = arith.constant 0 : index
    %39 = vector.load %arg12[%c0_29, %c0_30] : memref<16x128xf32, #tpu.memory_space<vmem>>, vector<16x128xf32>
    tpu.vector_store %arg12[%c0_29, %c0_30], %38 {strides = array<i32>} : memref<16x128xf32, #tpu.memory_space<vmem>>, vector<16x128xf32>,
    return
  }
  func.func @transform_0(%arg0: i32) -> (i32, i32) {
    %c0_i32 = arith.constant 0 : i32
    %c0_i32_0 = arith.constant 0 : i32
    return %arg0, %c0_i32 : i32, i32
  }
  func.func @transform_1(%arg0: i32) -> (i32, i32) {
    %c0_i32 = arith.constant 0 : i32
    %c0_i32_0 = arith.constant 0 : i32
    %c0_i32_1 = arith.constant 0 : i32
    return %c0_i32, %c0_i32_0 : i32, i32
  }
  func.func @transform_2(%arg0: i32) -> (i32, i32) {
    %c0_i32 = arith.constant 0 : i32
    %c0_i32_0 = arith.constant 0 : i32
    %c0_i32_1 = arith.constant 0 : i32
    return %c0_i32, %c0_i32_0 : i32, i32
  }
  func.func @transform_3(%arg0: i32) -> (i32, i32) {
    %c0_i32 = arith.constant 0 : i32
    %c0_i32_0 = arith.constant 0 : i32
    %c0_i32_1 = arith.constant 0 : i32
    return %c0_i32, %c0_i32_0 : i32, i32
  }
  func.func @transform_4(%arg0: i32) -> (i32, i32) {
    %c0_i32 = arith.constant 0 : i32
    %c0_i32_0 = arith.constant 0 : i32
    %c0_i32_1 = arith.constant 0 : i32
    return %c0_i32, %c0_i32_0 : i32, i32
  }
  func.func @transform_5(%arg0: i32) -> (i32, i32) {
    %c0_i32 = arith.constant 0 : i32
    %c0_i32_0 = arith.constant 0 : i32
    %c0_i32_1 = arith.constant 0 : i32
    return %c0_i32, %c0_i32_0 : i32, i32
  }
  func.func @transform_6(%arg0: i32) -> (i32, i32) {
    %c0_i32 = arith.constant 0 : i32
    %c0_i32_0 = arith.constant 0 : i32
    %c0_i32_1 = arith.constant 0 : i32
    return %c0_i32, %c0_i32_0 : i32, i32
  }
  func.func @transform_7(%arg0: i32) -> (i32, i32) {
    %c0_i32 = arith.constant 0 : i32
    %c0_i32_0 = arith.constant 0 : i32
    %c0_i32_1 = arith.constant 0 : i32
    return %c0_i32, %c0_i32_0 : i32, i32
  }
  func.func @transform_8(%arg0: i32) -> (i32, i32) {
    %c0_i32 = arith.constant 0 : i32
    %c0_i32_0 = arith.constant 0 : i32
    %c0_i32_1 = arith.constant 0 : i32
    return %c0_i32, %c0_i32_0 : i32, i32
  }
  func.func @transform_9(%arg0: i32) -> (i32, i32) {
    %c0_i32 = arith.constant 0 : i32
    %c0_i32_0 = arith.constant 0 : i32
    %c0_i32_1 = arith.constant 0 : i32
    return %c0_i32, %c0_i32_0 : i32, i32
  }
  func.func @transform_10(%arg0: i32) -> (i32, i32) {
    %c0_i32 = arith.constant 0 : i32
    %c0_i32_0 = arith.constant 0 : i32
    %c0_i32_1 = arith.constant 0 : i32
    return %c0_i32, %c0_i32_0 : i32, i32
  }
  func.func @transform_11(%arg0: i32) -> (i32, i32) {
    %c0_i32 = arith.constant 0 : i32
    %c0_i32_0 = arith.constant 0 : i32
    return %arg0, %c0_i32 : i32, i32
  }
}

</mosaic_0001>

<bundles_post_ra>
// kernel: neural_network_forward.1
= control target key start
LH: loop header
LB: loop body
LE: loop exit
PB: predicated region body
PF: predicated region fallthrough
CT: control target
= control target key end

     0   :  { %16 = vsyncpa [#allocation3], 0  ;;  %s4928_s0 = inlined_call_operand.vmem [shape: f32[16,784], index: 0, kind: input, shape index: {}]   ;;  %s4929_s1 = inlined_call_operand.hbm [shape: bf16[784,512], index: 1, kind: input, shape index: {}]   ;;  %s4930_s2 = inlined_call_operand.vmem [shape: f32[1,512], index: 2, kind: input, shape index: {}]   ;;  %s4931_s3 = inlined_call_operand.hbm [shape: bf16[512,512], index: 3, kind: input, shape index: {}]   ;;  %s4932_s4 = inlined_call_operand.vmem [shape: f32[1,512], index: 4, kind: input, shape index: {}]   ;;  %s4933_s5 = inlined_call_operand.hbm [shape: bf16[512,256], index: 5, kind: input, shape index: {}]   ;;  %s4934_s6 = inlined_call_operand.vmem [shape: f32[1,256], index: 6, kind: input, shape index: {}]   ;;  %s4935_s7 = inlined_call_operand.vmem [shape: bf16[256,128], index: 7, kind: input, shape index: {}]   ;;  %s4936_s8 = inlined_call_operand.vmem [shape: f32[1,128], index: 8, kind: input, shape index: {}]   ;;  %s4937_s9 = inlined_call_operand.vmem [shape: bf16[128,128], index: 9, kind: input, shape index: {}]   ;;  %s4938_s10 = inlined_call_operand.vmem [shape: f32[1,128], index: 10, kind: input, shape index: {}]   ;;  %s4939_s11 = inlined_call_operand.vmem [shape: f32[16,128], index: 11, kind: output, shape index: {}]  }
   0x1   :  { %17 = vsyncpa [#allocation5], 0  ;;  %s4629_s17 = smov [#allocation4]   ;;  %s4630_s19 = smov [#allocation2]  }
   0x2   :  { %s39_s18 = sshll.u32 %s4629_s17, 4  ;;  %s25_s20 = sshll.u32 %s4630_s19, 4  ;;  %s40_s18 = int_to_ptr.vmem [resolvable:$true] %s39_s18  ;;  %s4699_s20 = int_to_ptr.vmem [resolvable:$true] %s25_s20 }
   0x3   :  { %s4559_s23 = scalar_lea.hbm %s4931_s3, 16384 }
   0x4   :  { %p4560_p0 = scmp.ne.s32.totalorder %s4931_s3, %s4559_s23  ;;  %p4563_p1 = scmp.lt.u32.totalorder %s4559_s23, %s4931_s3 }
   0x6   :  { %p4565_p2 = pnand %p4563_p1, %p4560_p0 }
   0x8   :  { %4568 = shalt.err (!%p4565_p2)
}
   0x9   :  { %s4569_s28 = scalar_lea.vmem %s40_s18, 16384  ;;  %p4574_p4 = scmp.lt.s32.totalorder %s40_s18, %s40_s18 }
   0xa   :  { %p4570_p3 = scmp.ne.s32.totalorder %s40_s18, %s4569_s28  ;;  %p4575_p5 = scmp.lt.s32.totalorder %s4569_s28, %s4569_s28 }
   0xc   :  { %p4576_p6 = por %p4575_p5, %p4574_p4 }
   0xe   :  { %p4577_p7 = pnand %p4576_p6, %p4570_p3 }
  0x10   :  { %4580 = shalt.err (!%p4577_p7)
}
  0x11   :  { %s4631_s29 = smov 256   ;;  %s4632_s30 = smov 16  }
  0x12   :  { %45 = dma.hbm_to_vmem [thread:$0]  %s4931_s3, 16384, %s40_s18, [#allocation5], %s4631_s29, %s4631_s29, %s4632_s30  }
  0x13   :  { %s4581_s16 = scalar_lea.hbm %s4929_s1, 25088 }
  0x14   :  { %p4582_p8 = scmp.ne.s32.totalorder %s4929_s1, %s4581_s16  ;;  %p4585_p9 = scmp.lt.u32.totalorder %s4581_s16, %s4929_s1 }
  0x16   :  { %p4587_p10 = pnand %p4585_p9, %p4582_p8 }
  0x18   :  { %4590 = shalt.err (!%p4587_p10)
}
  0x19   :  { %s4591_s23 = scalar_lea.vmem %s4699_s20, 25088  ;;  %p4596_p12 = scmp.lt.s32.totalorder %s4699_s20, %s4699_s20 }
  0x1a   :  { %p4592_p11 = scmp.ne.s32.totalorder %s4699_s20, %s4591_s23  ;;  %p4597_p13 = scmp.lt.s32.totalorder %s4591_s23, %s4591_s23 }
  0x1c   :  { %p4598_p0 = por %p4597_p13, %p4596_p12 }
  0x1e   :  { %p4599_p1 = pnand %p4598_p0, %p4592_p11 }
  0x20   :  { %4602 = shalt.err (!%p4599_p1)
}
  0x21   :  { %31 = dma.hbm_to_vmem [thread:$0]  %s4929_s1, 25088, %s4699_s20, [#allocation3], %s4631_s29, %s4631_s29, %s4632_s30  }
  0x22   :  { %s4633_s24 = smov [#allocation6]   ;;  %s4603_s28 = scalar_lea.hbm %s4933_s5, 8192 }
  0x23   :  { %s53_s25 = sshll.u32 %s4633_s24, 4  ;;  %p4604_p2 = scmp.ne.s32.totalorder %s4933_s5, %s4603_s28  ;;  %s54_s25 = int_to_ptr.vmem [resolvable:$true] %s53_s25 }
  0x24   :  { %p4607_p3 = scmp.lt.u32.totalorder %s4603_s28, %s4933_s5 }
  0x26   :  { %p4609_p4 = pnand %p4607_p3, %p4604_p2 }
  0x28   :  { %4612 = shalt.err (!%p4609_p4)
}
  0x29   :  { %s4613_s16 = scalar_lea.vmem %s54_s25, 8192  ;;  %p4618_p6 = scmp.lt.s32.totalorder %s54_s25, %s54_s25 }
  0x2a   :  { %p4614_p5 = scmp.ne.s32.totalorder %s54_s25, %s4613_s16  ;;  %p4619_p7 = scmp.lt.s32.totalorder %s4613_s16, %s4613_s16 }
  0x2c   :  { %p4620_p8 = por %p4619_p7, %p4618_p6 }
  0x2e   :  { %p4621_p9 = pnand %p4620_p8, %p4614_p5 }
  0x30   :  { %4624 = shalt.err (!%p4621_p9)
}
  0x31   :  { %s4634_s1 = smov 128   ;;  %s4635_s20 = smov 8  }
  0x32   :  { %59 = dma.hbm_to_vmem [thread:$0]  %s4933_s5, 8192, %s54_s25, [#allocation5], %s4634_s1, %s4634_s1, %s4635_s20  }
  0x33   :  { %4625 = dma.done.wait [#allocation3], 25088  }
  0x34   :  { %4626 = vsyncadd [#allocation3], 4294942208 }
  0x35   :  { %4627 = dma.done.wait [#allocation5], 24576  }
  0x36   :  { %4628 = vsyncadd [#allocation5], 4294942720  ;;  %v4636_v0 = vmov 0   ;;  %v3953_v1 = vld [vmem:[#allocation2 + $0x4] ss:$16 sps:$4 sm:$0xff]   ;;  %v93_v10 = vld [vmem:[%s4928_s0 + $0x68] sm:$0xff] }
  0x37   :  { %1464 = vmatprep.mubr.bf16.mxu1 %v4636_v0  ;;  %v3955_v2 = vld [vmem:[#allocation2 + $0x604] ss:$16 sps:$4 sm:$0xff]   ;;  %1303 = vmatprep.subr.bf16.mxu0 %v3953_v1  ;;  %v3957_v3 = vld [vmem:[#allocation2] ss:$16 sps:$4 sm:$0xff]   ;;  %v3961_v6 = vld [vmem:[#allocation2 + $0x8] ss:$16 sps:$4 sm:$0xff]  }
  0x38   :  { %v3958_v4 = vld [vmem:[#allocation2 + $0x600] ss:$16 sps:$4 sm:$0xff]   ;;  %1432 = vmatprep.subr.bf16.mxu1 %v3955_v2  ;;  %v3959_v5 = vld [vmem:[#allocation2 + $0x24] ss:$16 sps:$4 sm:$0xff]   ;;  %1304 = vmatpush1.bf16.msra.mxu0 %v3957_v3  ;;  %v3963_v7 = vld [vmem:[#allocation2 + $0xc] ss:$16 sps:$4 sm:$0xff]  }
  0x39   :  { %1433 = vmatpush1.bf16.msra.mxu1 %v3958_v4  ;;  %1305 = vmatprep.subr.bf16.mxu0 %v3959_v5  ;;  %v3964_v8 = vld [vmem:[#allocation2 + $0x20] ss:$16 sps:$4 sm:$0xff]   ;;  %vm1299_vm0 = vcmask 130048   ;;  %v3965_v12 = vld [vmem:[#allocation2 + $0x44] ss:$16 sps:$4 sm:$0xff]   ;;  %v81_v51 = vld [vmem:[%s4928_s0 + $0x8] sm:$0xff] }
  0x3a   :  { %v86_v9 = vld [vmem:[%s4928_s0 + $0x30] sm:$0xff]  ;;  %1475 = vmatprep.subr.bf16.mxu1 %v3963_v7  ;;  %v3967_v13 = vld [vmem:[#allocation2 + $0x28] ss:$16 sps:$4 sm:$0xff]   ;;  %v3969_v14 = vld [vmem:[#allocation2 + $0x2c] ss:$16 sps:$4 sm:$0xff]   ;;  %vm4638_vm1 = vmmov 0  }
  0x3b   :  { %v4749_v11 = vpack.c.bf16 %v93_v10, %v86_v9  ;;  %v3970_v15 = vld [vmem:[#allocation2 + $0x40] ss:$16 sps:$4 sm:$0xff]   ;;  %v3971_v16 = vld [vmem:[#allocation2 + $0x64] ss:$16 sps:$4 sm:$0xff]   ;;  %v3975_v17 = vld [vmem:[#allocation2 + $0x4c] ss:$16 sps:$4 sm:$0xff]  }
  0x3c   :  { %1306 = vmatpush1.bf16.msra.mxu0 %v3964_v8  ;;  %v3976_v18 = vld [vmem:[#allocation2 + $0x60] ss:$16 sps:$4 sm:$0xff]   ;;  %v3973_v19 = vld [vmem:[#allocation2 + $0x48] ss:$16 sps:$4 sm:$0xff]   ;;  %v3977_v20 = vld [vmem:[#allocation2 + $0x84] ss:$16 sps:$4 sm:$0xff]  }
  0x3d   :  { %3616 = vmatmul.mubr.msk.bf16.vlgmr.msra.gmra.mrb[0].mxu1 %vm1299_vm0, %v4749_v11  ;;  %1307 = vmatprep.subr.bf16.mxu0 %v3965_v12  ;;  %v3981_v21 = vld [vmem:[#allocation2 + $0x6c] ss:$16 sps:$4 sm:$0xff]   ;;  %v3979_v22 = vld [vmem:[#allocation2 + $0x68] ss:$16 sps:$4 sm:$0xff]   ;;  %v3982_v23 = vld [vmem:[#allocation2 + $0x80] ss:$16 sps:$4 sm:$0xff]  }
  0x3e   :  { %1476 = vmatpush1.bf16.msra.mxu1 %v3961_v6  ;;  %v3983_v24 = vld [vmem:[#allocation2 + $0xa4] ss:$16 sps:$4 sm:$0xff]   ;;  %v3987_v25 = vld [vmem:[#allocation2 + $0x8c] ss:$16 sps:$4 sm:$0xff]   ;;  %v3988_v26 = vld [vmem:[#allocation2 + $0xa0] ss:$16 sps:$4 sm:$0xff]  }
  0x3f   :  { %1477 = vmatprep.subr.bf16.mxu1 %v3969_v14  ;;  %v3985_v27 = vld [vmem:[#allocation2 + $0x88] ss:$16 sps:$4 sm:$0xff]   ;;  %v3989_v28 = vld [vmem:[#allocation2 + $0xc4] ss:$16 sps:$4 sm:$0xff]   ;;  %v3993_v29 = vld [vmem:[#allocation2 + $0xac] ss:$16 sps:$4 sm:$0xff]  }
  0x40   :  { %1308 = vmatpush1.bf16.msra.mxu0 %v3970_v15  ;;  %v3991_v30 = vld [vmem:[#allocation2 + $0xa8] ss:$16 sps:$4 sm:$0xff]   ;;  %v3994_v31 = vld [vmem:[#allocation2 + $0xc0] ss:$16 sps:$4 sm:$0xff]   ;;  %v3995_v32 = vld [vmem:[#allocation2 + $0xe4] ss:$16 sps:$4 sm:$0xff]  }
  0x41   :  { %1309 = vmatprep.subr.bf16.mxu0 %v3971_v16  ;;  %v3999_v33 = vld [vmem:[#allocation2 + $0xcc] ss:$16 sps:$4 sm:$0xff]   ;;  %v4000_v34 = vld [vmem:[#allocation2 + $0xe0] ss:$16 sps:$4 sm:$0xff]   ;;  %v3997_v35 = vld [vmem:[#allocation2 + $0xc8] ss:$16 sps:$4 sm:$0xff]  }
  0x42   :  { %1478 = vmatpush1.bf16.msra.mxu1 %v3967_v13  ;;  %v4001_v36 = vld [vmem:[#allocation2 + $0x104] ss:$16 sps:$4 sm:$0xff]   ;;  %v4005_v37 = vld [vmem:[#allocation2 + $0xec] ss:$16 sps:$4 sm:$0xff]   ;;  %v4003_v38 = vld [vmem:[#allocation2 + $0xe8] ss:$16 sps:$4 sm:$0xff]  }
  0x43   :  { %1479 = vmatprep.subr.bf16.mxu1 %v3975_v17  ;;  %v4006_v39 = vld [vmem:[#allocation2 + $0x100] ss:$16 sps:$4 sm:$0xff]   ;;  %v4007_v40 = vld [vmem:[#allocation2 + $0x124] ss:$16 sps:$4 sm:$0xff]   ;;  %v4011_v41 = vld [vmem:[#allocation2 + $0x10c] ss:$16 sps:$4 sm:$0xff]  }
  0x44   :  { %1310 = vmatpush1.bf16.msra.mxu0 %v3976_v18  ;;  %v4012_v42 = vld [vmem:[#allocation2 + $0x120] ss:$16 sps:$4 sm:$0xff]   ;;  %v4009_v43 = vld [vmem:[#allocation2 + $0x108] ss:$16 sps:$4 sm:$0xff]   ;;  %v4013_v44 = vld [vmem:[#allocation2 + $0x144] ss:$16 sps:$4 sm:$0xff]  }
  0x45   :  { %1311 = vmatprep.subr.bf16.mxu0 %v3977_v20  ;;  %v4017_v45 = vld [vmem:[#allocation2 + $0x12c] ss:$16 sps:$4 sm:$0xff]   ;;  %v4015_v46 = vld [vmem:[#allocation2 + $0x128] ss:$16 sps:$4 sm:$0xff]   ;;  %v4018_v47 = vld [vmem:[#allocation2 + $0x140] ss:$16 sps:$4 sm:$0xff]  }
  0x46   :  { %1480 = vmatpush1.bf16.msra.mxu1 %v3973_v19  ;;  %v4019_v48 = vld [vmem:[#allocation2 + $0x164] ss:$16 sps:$4 sm:$0xff]   ;;  %v4023_v49 = vld [vmem:[#allocation2 + $0x14c] ss:$16 sps:$4 sm:$0xff]   ;;  %v4021_v50 = vld [vmem:[#allocation2 + $0x148] ss:$16 sps:$4 sm:$0xff]  }
  0x47   :  { %1481 = vmatprep.subr.bf16.mxu1 %v3981_v21  ;;  %v88_v52 = vld [vmem:[%s4928_s0 + $0x40] sm:$0xff]  ;;  %v4029_v56 = vld [vmem:[#allocation2 + $0x16c] ss:$16 sps:$4 sm:$0xff]   ;;  %v4027_v58 = vld [vmem:[#allocation2 + $0x168] ss:$16 sps:$4 sm:$0xff]  }
  0x48   :  { %1312 = vmatpush1.bf16.msra.mxu0 %v3982_v23  ;;  %v4024_v53 = vld [vmem:[#allocation2 + $0x160] ss:$16 sps:$4 sm:$0xff]   ;;  %v95_v54 = vpack.c.bf16 %v88_v52, %v81_v51  ;;  %v4025_v55 = vld [vmem:[#allocation2 + $0x184] ss:$16 sps:$4 sm:$0xff]   ;;  %v4035_v60 = vld [vmem:[#allocation2 + $0x18c] ss:$16 sps:$4 sm:$0xff]  }
  0x49   :  { %1313 = vmatprep.subr.bf16.mxu0 %v3983_v24  ;;  %v4030_v57 = vld [vmem:[#allocation2 + $0x180] ss:$16 sps:$4 sm:$0xff]   ;;  %v4031_v59 = vld [vmem:[#allocation2 + $0x1a4] ss:$16 sps:$4 sm:$0xff]   ;;  %v4033_v62 = vld [vmem:[#allocation2 + $0x188] ss:$16 sps:$4 sm:$0xff]  }
  0x4a   :  { %1482 = vmatpush1.bf16.msra.mxu1 %v3979_v22  ;;  %1335 = vmatprep.mubr.bf16.mxu0 %v95_v54  ;;  %v4036_v61 = vld [vmem:[#allocation2 + $0x1a0] ss:$16 sps:$4 sm:$0xff]   ;;  %v4037_v63 = vld [vmem:[#allocation2 + $0x1c4] ss:$16 sps:$4 sm:$0xff]   ;;  %v4041_v1 = vld [vmem:[#allocation2 + $0x1ac] ss:$16 sps:$4 sm:$0xff]  }
  0x4b   :  { %1483 = vmatprep.subr.bf16.mxu1 %v3987_v25  ;;  %1507 = vmatprep.mubr.bf16.mxu1 %v95_v54  ;;  %v4042_v2 = vld [vmem:[#allocation2 + $0x1c0] ss:$16 sps:$4 sm:$0xff]   ;;  %v4039_v3 = vld [vmem:[#allocation2 + $0x1a8] ss:$16 sps:$4 sm:$0xff]   ;;  %v4043_v4 = vld [vmem:[#allocation2 + $0x1e4] ss:$16 sps:$4 sm:$0xff]  }
  0x4c   :  { %1314 = vmatpush1.bf16.msra.mxu0 %v3988_v26  ;;  %v4047_v5 = vld [vmem:[#allocation2 + $0x1cc] ss:$16 sps:$4 sm:$0xff]   ;;  %v4048_v6 = vld [vmem:[#allocation2 + $0x1e0] ss:$16 sps:$4 sm:$0xff]   ;;  %v4045_v9 = vld [vmem:[#allocation2 + $0x1c8] ss:$16 sps:$4 sm:$0xff]  }
  0x4d   :  { %1315 = vmatprep.subr.bf16.mxu0 %v3989_v28  ;;  %v80_v7 = vld [vmem:[%s4928_s0] sm:$0xff]  ;;  %v87_v8 = vld [vmem:[%s4928_s0 + $0x38] sm:$0xff] }
  0x4e   :  { %1484 = vmatpush1.bf16.msra.mxu1 %v3985_v27  ;;  %v4051_v10 = vld [vmem:[#allocation2 + $0x204] ss:$16 sps:$4 sm:$0xff]   ;;  %v4054_v12 = vld [vmem:[#allocation2 + $0x1ec] ss:$16 sps:$4 sm:$0xff]   ;;  %v94_v13 = vpack.c.bf16 %v87_v8, %v80_v7  ;;  %v4049_v14 = vld [vmem:[#allocation2 + $0x200] ss:$16 sps:$4 sm:$0xff]  }
  0x4f   :  { %1485 = vmatprep.subr.bf16.mxu1 %v3993_v29  ;;  %v4052_v15 = vld [vmem:[#allocation2 + $0x1e8] ss:$16 sps:$4 sm:$0xff]   ;;  %v4057_v16 = vld [vmem:[#allocation2 + $0x224] ss:$16 sps:$4 sm:$0xff]   ;;  %v4060_v17 = vld [vmem:[#allocation2 + $0x20c] ss:$16 sps:$4 sm:$0xff]  }
  0x50   :  { %1316 = vmatpush1.bf16.msra.mxu0 %v3994_v31  ;;  %v4055_v18 = vld [vmem:[#allocation2 + $0x220] ss:$16 sps:$4 sm:$0xff]   ;;  %v4058_v19 = vld [vmem:[#allocation2 + $0x208] ss:$16 sps:$4 sm:$0xff]   ;;  %v4063_v20 = vld [vmem:[#allocation2 + $0x244] ss:$16 sps:$4 sm:$0xff]  }
  0x51   :  { %1317 = vmatprep.subr.bf16.mxu0 %v3995_v32  ;;  %v4066_v21 = vld [vmem:[#allocation2 + $0x22c] ss:$16 sps:$4 sm:$0xff]   ;;  %v4061_v22 = vld [vmem:[#allocation2 + $0x240] ss:$16 sps:$4 sm:$0xff]   ;;  %v4064_v23 = vld [vmem:[#allocation2 + $0x228] ss:$16 sps:$4 sm:$0xff]  }
  0x52   :  { %1486 = vmatpush1.bf16.msra.mxu1 %v3991_v30  ;;  %v4069_v24 = vld [vmem:[#allocation2 + $0x264] ss:$16 sps:$4 sm:$0xff]   ;;  %v4072_v25 = vld [vmem:[#allocation2 + $0x24c] ss:$16 sps:$4 sm:$0xff]   ;;  %v4067_v26 = vld [vmem:[#allocation2 + $0x260] ss:$16 sps:$4 sm:$0xff]  }
  0x53   :  { %1487 = vmatprep.subr.bf16.mxu1 %v3999_v33  ;;  %v4070_v27 = vld [vmem:[#allocation2 + $0x248] ss:$16 sps:$4 sm:$0xff]   ;;  %v4075_v28 = vld [vmem:[#allocation2 + $0x284] ss:$16 sps:$4 sm:$0xff]   ;;  %v4078_v29 = vld [vmem:[#allocation2 + $0x26c] ss:$16 sps:$4 sm:$0xff]  }
  0x54   :  { %1318 = vmatpush1.bf16.msra.mxu0 %v4000_v34  ;;  %v4073_v30 = vld [vmem:[#allocation2 + $0x280] ss:$16 sps:$4 sm:$0xff]   ;;  %v4076_v31 = vld [vmem:[#allocation2 + $0x268] ss:$16 sps:$4 sm:$0xff]   ;;  %v4081_v32 = vld [vmem:[#allocation2 + $0x2a4] ss:$16 sps:$4 sm:$0xff]  }
  0x55   :  { %1319 = vmatprep.subr.bf16.mxu0 %v4001_v36  ;;  %v4084_v33 = vld [vmem:[#allocation2 + $0x28c] ss:$16 sps:$4 sm:$0xff]   ;;  %v4079_v34 = vld [vmem:[#allocation2 + $0x2a0] ss:$16 sps:$4 sm:$0xff]   ;;  %v4087_v36 = vld [vmem:[#allocation2 + $0x2c4] ss:$16 sps:$4 sm:$0xff]  }
  0x56   :  { %1488 = vmatpush1.bf16.msra.mxu1 %v3997_v35  ;;  %v4082_v35 = vld [vmem:[#allocation2 + $0x288] ss:$16 sps:$4 sm:$0xff]   ;;  %v4105_v51 = vld [vmem:[#allocation2 + $0x324] ss:$16 sps:$4 sm:$0xff]   ;;  %v4108_v52 = vld [vmem:[#allocation2 + $0x30c] ss:$16 sps:$4 sm:$0xff]  }
  0x57   :  { %1489 = vmatprep.subr.bf16.mxu1 %v4005_v37  ;;  %v4090_v37 = vld [vmem:[#allocation2 + $0x2ac] ss:$16 sps:$4 sm:$0xff]   ;;  %v4106_v54 = vld [vmem:[#allocation2 + $0x308] ss:$16 sps:$4 sm:$0xff]   ;;  %v4135_v8 = vld [vmem:[#allocation2 + $0x3c4] ss:$16 sps:$4 sm:$0xff]  }
  0x58   :  { %1320 = vmatpush1.bf16.msra.mxu0 %v4006_v39  ;;  %v83_v39 = vld [vmem:[%s4928_s0 + $0x18] sm:$0xff] }
  0x59   :  { %1321 = vmatprep.subr.bf16.mxu0 %v4007_v40  ;;  %v90_v40 = vld [vmem:[%s4928_s0 + $0x50] sm:$0xff]  ;;  %v4130_v7 = vld [vmem:[#allocation2 + $0x388] ss:$16 sps:$4 sm:$0xff]  }
  0x5a   :  { %1490 = vmatpush1.bf16.msra.mxu1 %v4003_v38  ;;  %v4085_v38 = vld [vmem:[#allocation2 + $0x2c0] ss:$16 sps:$4 sm:$0xff]  }
  0x5b   :  { %1491 = vmatprep.subr.bf16.mxu1 %v4011_v41  ;;  %v4088_v41 = vld [vmem:[#allocation2 + $0x2a8] ss:$16 sps:$4 sm:$0xff]  }
  0x5c   :  { %1322 = vmatpush1.bf16.msra.mxu0 %v4012_v42  ;;  %v97_v42 = vpack.c.bf16 %v90_v40, %v83_v39  ;;  %v4171_v39 = vld [vmem:[#allocation2 + $0x484] ss:$16 sps:$4 sm:$0xff]   ;;  %v4174_v40 = vld [vmem:[#allocation2 + $0x46c] ss:$16 sps:$4 sm:$0xff]  }
  0x5d   :  { %1323 = vmatprep.subr.bf16.mxu0 %v4013_v44  ;;  %v4096_v44 = vld [vmem:[#allocation2 + $0x2cc] ss:$16 sps:$4 sm:$0xff]  }
  0x5e   :  { %1492 = vmatpush1.bf16.msra.mxu1 %v4009_v43  ;;  %v4093_v43 = vld [vmem:[#allocation2 + $0x2e4] ss:$16 sps:$4 sm:$0xff]  }
  0x5f   :  { %1493 = vmatprep.subr.bf16.mxu1 %v4017_v45  ;;  %v4091_v45 = vld [vmem:[#allocation2 + $0x2e0] ss:$16 sps:$4 sm:$0xff]  }
  0x60   :  { %1324 = vmatpush1.bf16.msra.mxu0 %v4018_v47  ;;  %v4099_v47 = vld [vmem:[#allocation2 + $0x304] ss:$16 sps:$4 sm:$0xff]  }
  0x61   :  { %1325 = vmatprep.subr.bf16.mxu0 %v4019_v48  ;;  %v4102_v48 = vld [vmem:[#allocation2 + $0x2ec] ss:$16 sps:$4 sm:$0xff]  }
  0x62   :  { %1494 = vmatpush1.bf16.msra.mxu1 %v4015_v46  ;;  %v4094_v46 = vld [vmem:[#allocation2 + $0x2c8] ss:$16 sps:$4 sm:$0xff]  }
  0x63   :  { %1495 = vmatprep.subr.bf16.mxu1 %v4023_v49  ;;  %v4097_v49 = vld [vmem:[#allocation2 + $0x300] ss:$16 sps:$4 sm:$0xff]  }
  0x64   :  { %1326 = vmatpush1.bf16.msra.mxu0 %v4024_v53  ;;  %v4103_v53 = vld [vmem:[#allocation2 + $0x320] ss:$16 sps:$4 sm:$0xff]  }
  0x65   :  { %1327 = vmatprep.subr.bf16.mxu0 %v4025_v55  ;;  %v4111_v55 = vld [vmem:[#allocation2 + $0x344] ss:$16 sps:$4 sm:$0xff]  }
  0x66   :  { %1496 = vmatpush1.bf16.msra.mxu1 %v4021_v50  ;;  %v4100_v50 = vld [vmem:[#allocation2 + $0x2e8] ss:$16 sps:$4 sm:$0xff]  }
  0x67   :  { %1497 = vmatprep.subr.bf16.mxu1 %v4029_v56  ;;  %v4114_v56 = vld [vmem:[#allocation2 + $0x32c] ss:$16 sps:$4 sm:$0xff]  }
  0x68   :  { %1328 = vmatpush1.bf16.msra.mxu0 %v4030_v57  ;;  %v4109_v57 = vld [vmem:[#allocation2 + $0x340] ss:$16 sps:$4 sm:$0xff]  }
  0x69   :  { %1329 = vmatprep.subr.bf16.mxu0 %v4031_v59  ;;  %v4117_v59 = vld [vmem:[#allocation2 + $0x364] ss:$16 sps:$4 sm:$0xff]  }
  0x6a   :  { %1498 = vmatpush1.bf16.msra.mxu1 %v4027_v58  ;;  %v4112_v58 = vld [vmem:[#allocation2 + $0x328] ss:$16 sps:$4 sm:$0xff]  }
  0x6b   :  { %1499 = vmatprep.subr.bf16.mxu1 %v4035_v60  ;;  %v4120_v60 = vld [vmem:[#allocation2 + $0x34c] ss:$16 sps:$4 sm:$0xff]  }
  0x6c   :  { %1330 = vmatpush1.bf16.msra.mxu0 %v4036_v61  ;;  %v4115_v61 = vld [vmem:[#allocation2 + $0x360] ss:$16 sps:$4 sm:$0xff]  }
  0x6d   :  { %1331 = vmatprep.subr.bf16.mxu0 %v4037_v63  ;;  %v4123_v63 = vld [vmem:[#allocation2 + $0x384] ss:$16 sps:$4 sm:$0xff]  }
  0x6e   :  { %1500 = vmatpush1.bf16.msra.mxu1 %v4033_v62  ;;  %v4118_v62 = vld [vmem:[#allocation2 + $0x348] ss:$16 sps:$4 sm:$0xff]  }
  0x6f   :  { %1501 = vmatprep.subr.bf16.mxu1 %v4041_v1  ;;  %v4126_v1 = vld [vmem:[#allocation2 + $0x36c] ss:$16 sps:$4 sm:$0xff]  }
  0x70   :  { %1332 = vmatpush1.bf16.msra.mxu0 %v4042_v2  ;;  %v4121_v2 = vld [vmem:[#allocation2 + $0x380] ss:$16 sps:$4 sm:$0xff]  }
  0x71   :  { %1333 = vmatprep.subr.bf16.mxu0 %v4043_v4  ;;  %v4129_v4 = vld [vmem:[#allocation2 + $0x3a4] ss:$16 sps:$4 sm:$0xff]  }
  0x72   :  { %1502 = vmatpush1.bf16.msra.mxu1 %v4039_v3  ;;  %v4124_v3 = vld [vmem:[#allocation2 + $0x368] ss:$16 sps:$4 sm:$0xff]  }
  0x73   :  { %1503 = vmatprep.subr.bf16.mxu1 %v4047_v5  ;;  %v4132_v5 = vld [vmem:[#allocation2 + $0x38c] ss:$16 sps:$4 sm:$0xff]  }
  0x74   :  { %1334 = vmatpush1.bf16.msra.mxu0 %v4048_v6  ;;  %v4127_v6 = vld [vmem:[#allocation2 + $0x3a0] ss:$16 sps:$4 sm:$0xff]  }
  0x75   :  { %1346 = vmatprep.subr.bf16.mxu0 %v4051_v10  ;;  %v4133_v10 = vld [vmem:[#allocation2 + $0x3c0] ss:$16 sps:$4 sm:$0xff]  }
  0x76   :  { %1504 = vmatpush1.bf16.msra.mxu1 %v4045_v9  ;;  %v4138_v9 = vld [vmem:[#allocation2 + $0x3ac] ss:$16 sps:$4 sm:$0xff]  }
  0x77   :  { %1505 = vmatprep.subr.bf16.mxu1 %v4054_v12  ;;  %1336 = vmatmul.mubr.bf16.vlgmr.msra.gmra.mrb[0].mxu0 %v94_v13  ;;  %v4136_v12 = vld [vmem:[#allocation2 + $0x3a8] ss:$16 sps:$4 sm:$0xff]  }
  0x78   :  { %1347 = vmatpush1.bf16.msra.mxu0 %v4049_v14  ;;  %1378 = vmatprep.mubr.bf16.mxu0 %v97_v42  ;;  %v4144_v14 = vld [vmem:[#allocation2 + $0x3cc] ss:$16 sps:$4 sm:$0xff]  }
  0x79   :  { %1348 = vmatprep.subr.bf16.mxu0 %v4057_v16  ;;  %v82_v16 = vld [vmem:[%s4928_s0 + $0x10] sm:$0xff] }
  0x7a   :  { %1506 = vmatpush1.bf16.msra.mxu1 %v4052_v15  ;;  %v4139_v15 = vld [vmem:[#allocation2 + $0x3e0] ss:$16 sps:$4 sm:$0xff]  }
  0x7b   :  { %1518 = vmatprep.subr.bf16.mxu1 %v4060_v17  ;;  %v89_v17 = vld [vmem:[%s4928_s0 + $0x48] sm:$0xff] }
  0x7c   :  { %1349 = vmatpush1.bf16.msra.mxu0 %v4055_v18  ;;  %v4142_v18 = vld [vmem:[#allocation2 + $0x3c8] ss:$16 sps:$4 sm:$0xff]  }
  0x7d   :  { %1508 = vmatmul.mubr.bf16.vlgmr.msra.gmra.mrb[4].mxu1 %v94_v13  ;;  %1350 = vmatprep.subr.bf16.mxu0 %v4063_v20  ;;  %v4141_v13 = vld [vmem:[#allocation2 + $0x3e4] ss:$16 sps:$4 sm:$0xff]   ;;  %v4150_v20 = vld [vmem:[#allocation2 + $0x3ec] ss:$16 sps:$4 sm:$0xff]  }
  0x7e   :  { %1519 = vmatpush1.bf16.msra.mxu1 %v4058_v19  ;;  %1550 = vmatprep.mubr.bf16.mxu1 %v97_v42  ;;  %v4147_v19 = vld [vmem:[#allocation2 + $0x404] ss:$16 sps:$4 sm:$0xff]   ;;  %v4172_v42 = vld [vmem:[#allocation2 + $0x468] ss:$16 sps:$4 sm:$0xff]  }
  0x7f   :  { %1520 = vmatprep.subr.bf16.mxu1 %v4066_v21  ;;  %v96_v21 = vpack.c.bf16 %v89_v17, %v82_v16  ;;  %v4226_v16 = vld [vmem:[#allocation2 + $0x588] ss:$16 sps:$4 sm:$0xff]   ;;  %v4231_v17 = vld [vmem:[#allocation2 + $0x5c4] ss:$16 sps:$4 sm:$0xff]  }
  0x80   :  { %1351 = vmatpush1.bf16.msra.mxu0 %v4061_v22  ;;  %v4145_v22 = vld [vmem:[#allocation2 + $0x400] ss:$16 sps:$4 sm:$0xff]  }
  0x81   :  { %1352 = vmatprep.subr.bf16.mxu0 %v4069_v24  ;;  %v4153_v24 = vld [vmem:[#allocation2 + $0x424] ss:$16 sps:$4 sm:$0xff]  }
  0x82   :  { %1521 = vmatpush1.bf16.msra.mxu1 %v4064_v23  ;;  %v4148_v23 = vld [vmem:[#allocation2 + $0x3e8] ss:$16 sps:$4 sm:$0xff]  }
  0x83   :  { %1522 = vmatprep.subr.bf16.mxu1 %v4072_v25  ;;  %v4156_v25 = vld [vmem:[#allocation2 + $0x40c] ss:$16 sps:$4 sm:$0xff]  }
  0x84   :  { %1353 = vmatpush1.bf16.msra.mxu0 %v4067_v26  ;;  %v85_v26 = vld [vmem:[%s4928_s0 + $0x28] sm:$0xff] }
  0x85   :  { %1354 = vmatprep.subr.bf16.mxu0 %v4075_v28  ;;  %v4151_v28 = vld [vmem:[#allocation2 + $0x420] ss:$16 sps:$4 sm:$0xff]  }
  0x86   :  { %1523 = vmatpush1.bf16.msra.mxu1 %v4070_v27  ;;  %v92_v27 = vld [vmem:[%s4928_s0 + $0x60] sm:$0xff] }
  0x87   :  { %1524 = vmatprep.subr.bf16.mxu1 %v4078_v29  ;;  %v99_v29 = vpack.c.bf16 %v92_v27, %v85_v26  ;;  %v4238_v26 = vld [vmem:[#allocation2 + $0x5c8] ss:$16 sps:$4 sm:$0xff]   ;;  %v4249_v27 = vld [vmem:[#allocation4 + $0x4] ss:$16 sps:$4 sm:$0xff]  }
  0x88   :  { %1355 = vmatpush1.bf16.msra.mxu0 %v4073_v30  ;;  %v4154_v30 = vld [vmem:[#allocation2 + $0x408] ss:$16 sps:$4 sm:$0xff]  }
  0x89   :  { %1356 = vmatprep.subr.bf16.mxu0 %v4081_v32  ;;  %v4162_v32 = vld [vmem:[#allocation2 + $0x42c] ss:$16 sps:$4 sm:$0xff]  }
  0x8a   :  { %1525 = vmatpush1.bf16.msra.mxu1 %v4076_v31  ;;  %v4159_v31 = vld [vmem:[#allocation2 + $0x444] ss:$16 sps:$4 sm:$0xff]  }
  0x8b   :  { %1526 = vmatprep.subr.bf16.mxu1 %v4084_v33  ;;  %v4157_v33 = vld [vmem:[#allocation2 + $0x440] ss:$16 sps:$4 sm:$0xff]  }
  0x8c   :  { %1357 = vmatpush1.bf16.msra.mxu0 %v4079_v34  ;;  %v4160_v34 = vld [vmem:[#allocation2 + $0x428] ss:$16 sps:$4 sm:$0xff]  }
  0x8d   :  { %1358 = vmatprep.subr.bf16.mxu0 %v4087_v36  ;;  %v4168_v36 = vld [vmem:[#allocation2 + $0x44c] ss:$16 sps:$4 sm:$0xff]  }
  0x8e   :  { %1527 = vmatpush1.bf16.msra.mxu1 %v4082_v35  ;;  %v4165_v35 = vld [vmem:[#allocation2 + $0x464] ss:$16 sps:$4 sm:$0xff]  }
  0x8f   :  { %1528 = vmatprep.subr.bf16.mxu1 %v4090_v37  ;;  %v4163_v37 = vld [vmem:[#allocation2 + $0x460] ss:$16 sps:$4 sm:$0xff]  }
  0x90   :  { %1359 = vmatpush1.bf16.msra.mxu0 %v4085_v38  ;;  %v4166_v38 = vld [vmem:[#allocation2 + $0x448] ss:$16 sps:$4 sm:$0xff]  }
  0x91   :  { %1360 = vmatprep.subr.bf16.mxu0 %v4093_v43  ;;  %v4177_v43 = vld [vmem:[#allocation2 + $0x4a4] ss:$16 sps:$4 sm:$0xff]  }
  0x92   :  { %1529 = vmatpush1.bf16.msra.mxu1 %v4088_v41  ;;  %v4169_v41 = vld [vmem:[#allocation2 + $0x480] ss:$16 sps:$4 sm:$0xff]  }
  0x93   :  { %1530 = vmatprep.subr.bf16.mxu1 %v4096_v44  ;;  %v4180_v44 = vld [vmem:[#allocation2 + $0x48c] ss:$16 sps:$4 sm:$0xff]  }
  0x94   :  { %1361 = vmatpush1.bf16.msra.mxu0 %v4091_v45  ;;  %v4175_v45 = vld [vmem:[#allocation2 + $0x4a0] ss:$16 sps:$4 sm:$0xff]  }
  0x95   :  { %1362 = vmatprep.subr.bf16.mxu0 %v4099_v47  ;;  %v4183_v47 = vld [vmem:[#allocation2 + $0x4c4] ss:$16 sps:$4 sm:$0xff]  }
  0x96   :  { %1531 = vmatpush1.bf16.msra.mxu1 %v4094_v46  ;;  %v4178_v46 = vld [vmem:[#allocation2 + $0x488] ss:$16 sps:$4 sm:$0xff]  }
  0x97   :  { %1532 = vmatprep.subr.bf16.mxu1 %v4102_v48  ;;  %v4186_v48 = vld [vmem:[#allocation2 + $0x4ac] ss:$16 sps:$4 sm:$0xff]  }
  0x98   :  { %1363 = vmatpush1.bf16.msra.mxu0 %v4097_v49  ;;  %v4181_v49 = vld [vmem:[#allocation2 + $0x4c0] ss:$16 sps:$4 sm:$0xff]  }
  0x99   :  { %1364 = vmatprep.subr.bf16.mxu0 %v4105_v51  ;;  %v4189_v51 = vld [vmem:[#allocation2 + $0x4e4] ss:$16 sps:$4 sm:$0xff]  }
  0x9a   :  { %1533 = vmatpush1.bf16.msra.mxu1 %v4100_v50  ;;  %v4184_v50 = vld [vmem:[#allocation2 + $0x4a8] ss:$16 sps:$4 sm:$0xff]  }
  0x9b   :  { %1534 = vmatprep.subr.bf16.mxu1 %v4108_v52  ;;  %v4192_v52 = vld [vmem:[#allocation2 + $0x4cc] ss:$16 sps:$4 sm:$0xff]  }
  0x9c   :  { %1365 = vmatpush1.bf16.msra.mxu0 %v4103_v53  ;;  %v4187_v53 = vld [vmem:[#allocation2 + $0x4e0] ss:$16 sps:$4 sm:$0xff]  }
  0x9d   :  { %1366 = vmatprep.subr.bf16.mxu0 %v4111_v55  ;;  %v4195_v55 = vld [vmem:[#allocation2 + $0x504] ss:$16 sps:$4 sm:$0xff]  }
  0x9e   :  { %1535 = vmatpush1.bf16.msra.mxu1 %v4106_v54  ;;  %v4190_v54 = vld [vmem:[#allocation2 + $0x4c8] ss:$16 sps:$4 sm:$0xff]  }
  0x9f   :  { %1536 = vmatprep.subr.bf16.mxu1 %v4114_v56  ;;  %v4198_v56 = vld [vmem:[#allocation2 + $0x4ec] ss:$16 sps:$4 sm:$0xff]  }
  0xa0   :  { %1367 = vmatpush1.bf16.msra.mxu0 %v4109_v57  ;;  %v4193_v57 = vld [vmem:[#allocation2 + $0x500] ss:$16 sps:$4 sm:$0xff]  }
  0xa1   :  { %1368 = vmatprep.subr.bf16.mxu0 %v4117_v59  ;;  %v4201_v59 = vld [vmem:[#allocation2 + $0x524] ss:$16 sps:$4 sm:$0xff]  }
  0xa2   :  { %1537 = vmatpush1.bf16.msra.mxu1 %v4112_v58  ;;  %v4196_v58 = vld [vmem:[#allocation2 + $0x4e8] ss:$16 sps:$4 sm:$0xff]  }
  0xa3   :  { %1538 = vmatprep.subr.bf16.mxu1 %v4120_v60  ;;  %v4204_v60 = vld [vmem:[#allocation2 + $0x50c] ss:$16 sps:$4 sm:$0xff]  }
  0xa4   :  { %1369 = vmatpush1.bf16.msra.mxu0 %v4115_v61  ;;  %v4199_v61 = vld [vmem:[#allocation2 + $0x520] ss:$16 sps:$4 sm:$0xff]  }
  0xa5   :  { %1370 = vmatprep.subr.bf16.mxu0 %v4123_v63  ;;  %v4207_v63 = vld [vmem:[#allocation2 + $0x544] ss:$16 sps:$4 sm:$0xff]  }
  0xa6   :  { %1539 = vmatpush1.bf16.msra.mxu1 %v4118_v62  ;;  %v4202_v62 = vld [vmem:[#allocation2 + $0x508] ss:$16 sps:$4 sm:$0xff]  }
  0xa7   :  { %1540 = vmatprep.subr.bf16.mxu1 %v4126_v1  ;;  %v4210_v1 = vld [vmem:[#allocation2 + $0x52c] ss:$16 sps:$4 sm:$0xff]  }
  0xa8   :  { %1371 = vmatpush1.bf16.msra.mxu0 %v4121_v2  ;;  %v4205_v2 = vld [vmem:[#allocation2 + $0x540] ss:$16 sps:$4 sm:$0xff]  }
  0xa9   :  { %1372 = vmatprep.subr.bf16.mxu0 %v4129_v4  ;;  %v4213_v4 = vld [vmem:[#allocation2 + $0x564] ss:$16 sps:$4 sm:$0xff]  }
  0xaa   :  { %1541 = vmatpush1.bf16.msra.mxu1 %v4124_v3  ;;  %v4208_v3 = vld [vmem:[#allocation2 + $0x528] ss:$16 sps:$4 sm:$0xff]  }
  0xab   :  { %1542 = vmatprep.subr.bf16.mxu1 %v4132_v5  ;;  %v4211_v5 = vld [vmem:[#allocation2 + $0x560] ss:$16 sps:$4 sm:$0xff]  }
  0xac   :  { %1373 = vmatpush1.bf16.msra.mxu0 %v4127_v6  ;;  %v4216_v6 = vld [vmem:[#allocation2 + $0x54c] ss:$16 sps:$4 sm:$0xff]  }
  0xad   :  { %1374 = vmatprep.subr.bf16.mxu0 %v4135_v8  ;;  %v4219_v8 = vld [vmem:[#allocation2 + $0x584] ss:$16 sps:$4 sm:$0xff]  }
  0xae   :  { %1543 = vmatpush1.bf16.msra.mxu1 %v4130_v7  ;;  %v4214_v7 = vld [vmem:[#allocation2 + $0x548] ss:$16 sps:$4 sm:$0xff]  }
  0xaf   :  { %1544 = vmatprep.subr.bf16.mxu1 %v4138_v9  ;;  %v4222_v9 = vld [vmem:[#allocation2 + $0x56c] ss:$16 sps:$4 sm:$0xff]  }
  0xb0   :  { %1375 = vmatpush1.bf16.msra.mxu0 %v4133_v10  ;;  %v4217_v10 = vld [vmem:[#allocation2 + $0x580] ss:$16 sps:$4 sm:$0xff]  }
  0xb1   :  { %1376 = vmatprep.subr.bf16.mxu0 %v4141_v13  ;;  %v4225_v13 = vld [vmem:[#allocation2 + $0x5a4] ss:$16 sps:$4 sm:$0xff]  }
  0xb2   :  { %1545 = vmatpush1.bf16.msra.mxu1 %v4136_v12  ;;  %v4220_v12 = vld [vmem:[#allocation2 + $0x568] ss:$16 sps:$4 sm:$0xff]  }
  0xb3   :  { %1546 = vmatprep.subr.bf16.mxu1 %v4144_v14  ;;  %v4228_v14 = vld [vmem:[#allocation2 + $0x58c] ss:$16 sps:$4 sm:$0xff]  }
  0xb4   :  { %1377 = vmatpush1.bf16.msra.mxu0 %v4139_v15  ;;  %v4223_v15 = vld [vmem:[#allocation2 + $0x5a0] ss:$16 sps:$4 sm:$0xff]  }
  0xb5   :  { %1389 = vmatprep.subr.bf16.mxu0 %v4147_v19  ;;  %v4229_v19 = vld [vmem:[#allocation2 + $0x5c0] ss:$16 sps:$4 sm:$0xff]  }
  0xb6   :  { %1547 = vmatpush1.bf16.msra.mxu1 %v4142_v18  ;;  %v4234_v18 = vld [vmem:[#allocation2 + $0x5ac] ss:$16 sps:$4 sm:$0xff]  }
  0xb7   :  { %1548 = vmatprep.subr.bf16.mxu1 %v4150_v20  ;;  %1379 = vmatmul.mubr.bf16.vlgmr.msra.gmra.mrb[0].mxu0 %v96_v21  ;;  %v4232_v20 = vld [vmem:[#allocation2 + $0x5a8] ss:$16 sps:$4 sm:$0xff]  }
  0xb8   :  { %1390 = vmatpush1.bf16.msra.mxu0 %v4145_v22  ;;  %1421 = vmatprep.mubr.bf16.mxu0 %v99_v29  ;;  %v4240_v22 = vld [vmem:[#allocation2 + $0x5cc] ss:$16 sps:$4 sm:$0xff]  }
  0xb9   :  { %1391 = vmatprep.subr.bf16.mxu0 %v4153_v24  ;;  %v84_v24 = vld [vmem:[%s4928_s0 + $0x20] sm:$0xff] }
  0xba   :  { %1549 = vmatpush1.bf16.msra.mxu1 %v4148_v23  ;;  %v4235_v23 = vld [vmem:[#allocation2 + $0x5e0] ss:$16 sps:$4 sm:$0xff]  }
  0xbb   :  { %1561 = vmatprep.subr.bf16.mxu1 %v4156_v25  ;;  %v91_v25 = vld [vmem:[%s4928_s0 + $0x58] sm:$0xff] }
  0xbc   :  { %1392 = vmatpush1.bf16.msra.mxu0 %v4151_v28  ;;  %v4243_v28 = vld [vmem:[#allocation2 + $0x5ec] ss:$16 sps:$4 sm:$0xff]  }
  0xbd   :  { %1551 = vmatmul.mubr.bf16.vlgmr.msra.gmra.mrb[4].mxu1 %v96_v21  ;;  %1393 = vmatprep.subr.bf16.mxu0 %v4159_v31  ;;  %v4237_v21 = vld [vmem:[#allocation2 + $0x5e4] ss:$16 sps:$4 sm:$0xff]   ;;  %v4241_v31 = vld [vmem:[#allocation2 + $0x5e8] ss:$16 sps:$4 sm:$0xff]  }
  0xbe   :  { %1562 = vmatpush1.bf16.msra.mxu1 %v4154_v30  ;;  %1593 = vmatprep.mubr.bf16.mxu1 %v99_v29  ;;  %v4247_v29 = vld [vmem:[#allocation4] ss:$16 sps:$4 sm:$0xff]   ;;  %v98_v30 = vpack.c.bf16 %v91_v25, %v84_v24  ;;  %v4327_v24 = vld [vmem:[#allocation4 + $0x1a4] ss:$16 sps:$4 sm:$0xff]   ;;  %v4330_v25 = vld [vmem:[#allocation4 + $0x1ac] ss:$16 sps:$4 sm:$0xff]  }
  0xbf   :  { %1563 = vmatprep.subr.bf16.mxu1 %v4162_v32  ;;  %v4255_v32 = vld [vmem:[#allocation4 + $0x24] ss:$16 sps:$4 sm:$0xff]  }
  0xc0   :  { %1394 = vmatpush1.bf16.msra.mxu0 %v4157_v33  ;;  %v4246_v33 = vld [vmem:[#allocation2 + $0x60c] ss:$16 sps:$4 sm:$0xff]  }
  0xc1   :  { %1395 = vmatprep.subr.bf16.mxu0 %v4165_v35  ;;  %v4244_v35 = vld [vmem:[#allocation2 + $0x608] ss:$16 sps:$4 sm:$0xff]  }
  0xc2   :  { %1564 = vmatpush1.bf16.msra.mxu1 %v4160_v34  ;;  %v4253_v34 = vld [vmem:[#allocation4 + $0x20] ss:$16 sps:$4 sm:$0xff]  }
  0xc3   :  { %1565 = vmatprep.subr.bf16.mxu1 %v4168_v36  ;;  %v4252_v36 = vld [vmem:[#allocation4 + $0xc] ss:$16 sps:$4 sm:$0xff]  }
  0xc4   :  { %1396 = vmatpush1.bf16.msra.mxu0 %v4163_v37  ;;  %v4261_v37 = vld [vmem:[#allocation4 + $0x44] ss:$16 sps:$4 sm:$0xff]  }
  0xc5   :  { %1397 = vmatprep.subr.bf16.mxu0 %v4171_v39  ;;  %v4267_v39 = vld [vmem:[#allocation4 + $0x64] ss:$16 sps:$4 sm:$0xff]  }
  0xc6   :  { %1566 = vmatpush1.bf16.msra.mxu1 %v4166_v38  ;;  %v4259_v38 = vld [vmem:[#allocation4 + $0x40] ss:$16 sps:$4 sm:$0xff]  }
  0xc7   :  { %1567 = vmatprep.subr.bf16.mxu1 %v4174_v40  ;;  %v4265_v40 = vld [vmem:[#allocation4 + $0x60] ss:$16 sps:$4 sm:$0xff]  }
  0xc8   :  { %1398 = vmatpush1.bf16.msra.mxu0 %v4169_v41  ;;  %v4273_v41 = vld [vmem:[#allocation4 + $0x84] ss:$16 sps:$4 sm:$0xff]  }
  0xc9   :  { %1399 = vmatprep.subr.bf16.mxu0 %v4177_v43  ;;  %v4250_v43 = vld [vmem:[#allocation4 + $0x8] ss:$16 sps:$4 sm:$0xff]  }
  0xca   :  { %1568 = vmatpush1.bf16.msra.mxu1 %v4172_v42  ;;  %v4271_v42 = vld [vmem:[#allocation4 + $0x80] ss:$16 sps:$4 sm:$0xff]  }
  0xcb   :  { %1569 = vmatprep.subr.bf16.mxu1 %v4180_v44  ;;  %v4279_v44 = vld [vmem:[#allocation4 + $0xa4] ss:$16 sps:$4 sm:$0xff]  }
  0xcc   :  { %1400 = vmatpush1.bf16.msra.mxu0 %v4175_v45  ;;  %v4258_v45 = vld [vmem:[#allocation4 + $0x2c] ss:$16 sps:$4 sm:$0xff]  }
  0xcd   :  { %1401 = vmatprep.subr.bf16.mxu0 %v4183_v47  ;;  %v4256_v47 = vld [vmem:[#allocation4 + $0x28] ss:$16 sps:$4 sm:$0xff]  }
  0xce   :  { %1570 = vmatpush1.bf16.msra.mxu1 %v4178_v46  ;;  %v4277_v46 = vld [vmem:[#allocation4 + $0xa0] ss:$16 sps:$4 sm:$0xff]  }
  0xcf   :  { %1571 = vmatprep.subr.bf16.mxu1 %v4186_v48  ;;  %v4285_v48 = vld [vmem:[#allocation4 + $0xc4] ss:$16 sps:$4 sm:$0xff]  }
  0xd0   :  { %1402 = vmatpush1.bf16.msra.mxu0 %v4181_v49  ;;  %v4264_v49 = vld [vmem:[#allocation4 + $0x4c] ss:$16 sps:$4 sm:$0xff]  }
  0xd1   :  { %1403 = vmatprep.subr.bf16.mxu0 %v4189_v51  ;;  %v4291_v51 = vld [vmem:[#allocation4 + $0xe4] ss:$16 sps:$4 sm:$0xff]  }
  0xd2   :  { %1572 = vmatpush1.bf16.msra.mxu1 %v4184_v50  ;;  %v4262_v50 = vld [vmem:[#allocation4 + $0x48] ss:$16 sps:$4 sm:$0xff]  }
  0xd3   :  { %1573 = vmatprep.subr.bf16.mxu1 %v4192_v52  ;;  %v4270_v52 = vld [vmem:[#allocation4 + $0x6c] ss:$16 sps:$4 sm:$0xff]  }
  0xd4   :  { %1404 = vmatpush1.bf16.msra.mxu0 %v4187_v53  ;;  %v4289_v53 = vld [vmem:[#allocation4 + $0xe0] ss:$16 sps:$4 sm:$0xff]  }
  0xd5   :  { %1405 = vmatprep.subr.bf16.mxu0 %v4195_v55  ;;  %v4268_v55 = vld [vmem:[#allocation4 + $0x68] ss:$16 sps:$4 sm:$0xff]  }
  0xd6   :  { %1574 = vmatpush1.bf16.msra.mxu1 %v4190_v54 }
  0xd7   :  { %1575 = vmatprep.subr.bf16.mxu1 %v4198_v56  ;;  %v4297_v56 = vld [vmem:[#allocation4 + $0x104] ss:$16 sps:$4 sm:$0xff]  }
  0xd8   :  { %1406 = vmatpush1.bf16.msra.mxu0 %v4193_v57 }
  0xd9   :  { %1407 = vmatprep.subr.bf16.mxu0 %v4201_v59 }
  0xda   :  { %1576 = vmatpush1.bf16.msra.mxu1 %v4196_v58 }
  0xdb   :  { %1577 = vmatprep.subr.bf16.mxu1 %v4204_v60  ;;  %v4295_v60 = vld [vmem:[#allocation4 + $0x100] ss:$16 sps:$4 sm:$0xff]  }
  0xdc   :  { %1408 = vmatpush1.bf16.msra.mxu0 %v4199_v61  ;;  %v4274_v61 = vld [vmem:[#allocation4 + $0x88] ss:$16 sps:$4 sm:$0xff]  }
  0xdd   :  { %1409 = vmatprep.subr.bf16.mxu0 %v4207_v63  ;;  %v4282_v63 = vld [vmem:[#allocation4 + $0xac] ss:$16 sps:$4 sm:$0xff]  }
  0xde   :  { %1578 = vmatpush1.bf16.msra.mxu1 %v4202_v62  ;;  %v4303_v62 = vld [vmem:[#allocation4 + $0x124] ss:$16 sps:$4 sm:$0xff]  }
  0xdf   :  { %1579 = vmatprep.subr.bf16.mxu1 %v4210_v1  ;;  %v4301_v1 = vld [vmem:[#allocation4 + $0x120] ss:$16 sps:$4 sm:$0xff]  }
  0xe0   :  { %1410 = vmatpush1.bf16.msra.mxu0 %v4205_v2  ;;  %v4280_v2 = vld [vmem:[#allocation4 + $0xa8] ss:$16 sps:$4 sm:$0xff]  }
  0xe1   :  { %1411 = vmatprep.subr.bf16.mxu0 %v4213_v4  ;;  %v4288_v4 = vld [vmem:[#allocation4 + $0xcc] ss:$16 sps:$4 sm:$0xff]  }
  0xe2   :  { %1580 = vmatpush1.bf16.msra.mxu1 %v4208_v3  ;;  %v4309_v3 = vld [vmem:[#allocation4 + $0x144] ss:$16 sps:$4 sm:$0xff]  }
  0xe3   :  { %1581 = vmatprep.subr.bf16.mxu1 %v4216_v6  ;;  %v4286_v6 = vld [vmem:[#allocation4 + $0xc8] ss:$16 sps:$4 sm:$0xff]  }
  0xe4   :  { %1412 = vmatpush1.bf16.msra.mxu0 %v4211_v5  ;;  %v4307_v5 = vld [vmem:[#allocation4 + $0x140] ss:$16 sps:$4 sm:$0xff]  }
  0xe5   :  { %1413 = vmatprep.subr.bf16.mxu0 %v4219_v8  ;;  %v4294_v8 = vld [vmem:[#allocation4 + $0xec] ss:$16 sps:$4 sm:$0xff]  }
  0xe6   :  { %1582 = vmatpush1.bf16.msra.mxu1 %v4214_v7  ;;  %v4315_v7 = vld [vmem:[#allocation4 + $0x164] ss:$16 sps:$4 sm:$0xff]  }
  0xe7   :  { %1583 = vmatprep.subr.bf16.mxu1 %v4222_v9  ;;  %v4313_v9 = vld [vmem:[#allocation4 + $0x160] ss:$16 sps:$4 sm:$0xff]  }
  0xe8   :  { %1414 = vmatpush1.bf16.msra.mxu0 %v4217_v10  ;;  %v4292_v10 = vld [vmem:[#allocation4 + $0xe8] ss:$16 sps:$4 sm:$0xff]  }
  0xe9   :  { %1415 = vmatprep.subr.bf16.mxu0 %v4225_v13  ;;  %v4300_v13 = vld [vmem:[#allocation4 + $0x10c] ss:$16 sps:$4 sm:$0xff]  }
  0xea   :  { %1584 = vmatpush1.bf16.msra.mxu1 %v4220_v12  ;;  %v4321_v12 = vld [vmem:[#allocation4 + $0x184] ss:$16 sps:$4 sm:$0xff]  }
  0xeb   :  { %1585 = vmatprep.subr.bf16.mxu1 %v4228_v14  ;;  %v4319_v14 = vld [vmem:[#allocation4 + $0x180] ss:$16 sps:$4 sm:$0xff]  }
  0xec   :  { %1416 = vmatpush1.bf16.msra.mxu0 %v4223_v15  ;;  %v4298_v15 = vld [vmem:[#allocation4 + $0x108] ss:$16 sps:$4 sm:$0xff]  }
  0xed   :  { %1417 = vmatprep.subr.bf16.mxu0 %v4231_v17  ;;  %v4304_v17 = vld [vmem:[#allocation4 + $0x128] ss:$16 sps:$4 sm:$0xff]  }
  0xee   :  { %1586 = vmatpush1.bf16.msra.mxu1 %v4226_v16  ;;  %v4306_v16 = vld [vmem:[#allocation4 + $0x12c] ss:$16 sps:$4 sm:$0xff]  }
  0xef   :  { %1587 = vmatprep.subr.bf16.mxu1 %v4234_v18  ;;  %v4312_v18 = vld [vmem:[#allocation4 + $0x14c] ss:$16 sps:$4 sm:$0xff]  }
  0xf0   :  { %1418 = vmatpush1.bf16.msra.mxu0 %v4229_v19  ;;  %v4310_v19 = vld [vmem:[#allocation4 + $0x148] ss:$16 sps:$4 sm:$0xff]  }
  0xf1   :  { %1419 = vmatprep.subr.bf16.mxu0 %v4237_v21  ;;  %v4316_v21 = vld [vmem:[#allocation4 + $0x168] ss:$16 sps:$4 sm:$0xff]  }
  0xf2   :  { %1588 = vmatpush1.bf16.msra.mxu1 %v4232_v20  ;;  %v4318_v20 = vld [vmem:[#allocation4 + $0x16c] ss:$16 sps:$4 sm:$0xff]  }
  0xf3   :  { %1589 = vmatprep.subr.bf16.mxu1 %v4240_v22  ;;  %v4324_v22 = vld [vmem:[#allocation4 + $0x18c] ss:$16 sps:$4 sm:$0xff]  }
  0xf4   :  { %1420 = vmatpush1.bf16.msra.mxu0 %v4235_v23  ;;  %v4322_v23 = vld [vmem:[#allocation4 + $0x188] ss:$16 sps:$4 sm:$0xff]  }
  0xf5   :  { %2449 = vmatprep.subr.bf16.mxu0 %v4249_v27  ;;  %v4328_v27 = vld [vmem:[#allocation4 + $0x1a8] ss:$16 sps:$4 sm:$0xff]  }
  0xf6   :  { %1590 = vmatpush1.bf16.msra.mxu1 %v4238_v26  ;;  %v4325_v26 = vld [vmem:[#allocation4 + $0x1a0] ss:$16 sps:$4 sm:$0xff]  }
  0xf7   :  { %1591 = vmatprep.subr.bf16.mxu1 %v4243_v28  ;;  %1422 = vmatmul.mubr.bf16.vlgmr.msra.gmra.mrb[0].mxu0 %v98_v30  ;;  %v4333_v28 = vld [vmem:[#allocation4 + $0x1c4] ss:$16 sps:$4 sm:$0xff]  }
  0xf8   :  { %2450 = vmatpush1.bf16.msra.mxu0 %v4247_v29  ;;  %v4336_v29 = vld [vmem:[#allocation4 + $0x1cc] ss:$16 sps:$4 sm:$0xff]  }
  0xf9   :  { %2451 = vmatprep.subr.bf16.mxu0 %v4255_v32  ;;  %v4339_v32 = vld [vmem:[#allocation4 + $0x1e4] ss:$16 sps:$4 sm:$0xff]  }
  0xfa   :  { %1592 = vmatpush1.bf16.msra.mxu1 %v4241_v31  ;;  %v4334_v31 = vld [vmem:[#allocation4 + $0x1c8] ss:$16 sps:$4 sm:$0xff]  }
  0xfb   :  { %1604 = vmatprep.subr.bf16.mxu1 %v4246_v33  ;;  %v4342_v33 = vld [vmem:[#allocation4 + $0x1ec] ss:$16 sps:$4 sm:$0xff]  }
  0xfc   :  { %2452 = vmatpush1.bf16.msra.mxu0 %v4253_v34  ;;  %v4337_v34 = vld [vmem:[#allocation4 + $0x1e0] ss:$16 sps:$4 sm:$0xff]  }
  0xfd   :  { %1594 = vmatmul.mubr.bf16.vlgmr.msra.gmra.mrb[4].mxu1 %v98_v30  ;;  %2453 = vmatprep.subr.bf16.mxu0 %v4261_v37  ;;  %v4331_v30 = vld [vmem:[#allocation4 + $0x1c0] ss:$16 sps:$4 sm:$0xff]   ;;  %v4348_v37 = vld [vmem:[#allocation4 + $0x20c] ss:$16 sps:$4 sm:$0xff]  }
  0xfe   :  { %1605 = vmatpush1.bf16.msra.mxu1 %v4244_v35  ;;  %1636 = vmatprep.mubr.bf16.mxu1 %v4636_v0  ;;  %v4283_v0 = vld [vmem:[#allocation4 + $0xc0] ss:$16 sps:$4 sm:$0xff]   ;;  %v4340_v35 = vld [vmem:[#allocation4 + $0x1e8] ss:$16 sps:$4 sm:$0xff]  }
  0xff   :  { %2535 = vmatprep.subr.bf16.mxu1 %v4252_v36  ;;  %v4345_v36 = vld [vmem:[#allocation4 + $0x204] ss:$16 sps:$4 sm:$0xff]  }
 0x100   :  { %2454 = vmatpush1.bf16.msra.mxu0 %v4259_v38  ;;  %v299_v38 = vlaneseq }
 0x101   :  { %2455 = vmatprep.subr.bf16.mxu0 %v4267_v39 }
 0x102   :  { %v4800_v39 = vshrl.u32 %v299_v38, 7  ;;  %v4376_v38 = vld [vmem:[#allocation4 + $0x2a8] ss:$16 sps:$4 sm:$0xff]  }
 0x104   :  { %2456 = vmatpush1.bf16.msra.mxu0 %v4265_v40  ;;  %v4803_v40 = vsub.s32 0, %v4800_v39 }
 0x105   :  { %2457 = vmatprep.subr.bf16.mxu0 %v4273_v41  ;;  %v297_v41 = vld [vmem:[%s4930_s2] sm:$0xf] }
 0x108   :  { %2458 = vmatpush1.bf16.msra.mxu0 %v4271_v42  ;;  %v4809_v42 = vsub.s32 1, %v4800_v39 }
 0x109   :  { %3617 = vmatmul.mubr.msk.bf16.vlgmr.msra.gmra.mrb[4].mxu1 %vm1299_vm0, %v4749_v11  ;;  %2459 = vmatprep.subr.bf16.mxu0 %v4279_v44  ;;  %v4276_v11 = vld [vmem:[#allocation4 + $0x8c] ss:$16 sps:$4 sm:$0xff]  }
 0x10a   :  { %2536 = vmatpush1.bf16.msra.mxu1 %v4250_v43  ;;  %v302_v43 = vrot.slane %v297_v41, %v4803_v40  ;;  %v306_v44 = vrot.slane %v297_v41, %v4809_v42 }
 0x10b   :  { %2537 = vmatprep.subr.bf16.mxu1 %v4258_v45 }
 0x10c   :  { %2460 = vmatpush1.bf16.msra.mxu0 %v4277_v46 }
 0x10d   :  { %2461 = vmatprep.subr.bf16.mxu0 %v4285_v48 }
 0x10e   :  { %2538 = vmatpush1.bf16.msra.mxu1 %v4256_v47 }
 0x10f   :  { %2539 = vmatprep.subr.bf16.mxu1 %v4264_v49 }
 0x110   :  { %v4792_v54 = vpop.f32.mrb[0].mxu1  ;;  %2462 = vmatpush1.bf16.msra.mxu0 %v4283_v0 }
 0x111   :  { %v4794_v57 = vpop.f32.mrb[1].mxu1  ;;  %2463 = vmatprep.subr.bf16.mxu0 %v4291_v51 }
 0x112   :  { %v4796_v58 = vpop.f32.mrb[2].mxu1  ;;  %2540 = vmatpush1.bf16.msra.mxu1 %v4262_v50 }
 0x113   :  { %v4798_v59 = vpop.f32.mrb[3].mxu1  ;;  %2541 = vmatprep.subr.bf16.mxu1 %v4270_v52 }
 0x114   :  { %2464 = vmatpush1.bf16.msra.mxu0 %v4289_v53 }
 0x115   :  { %2465 = vmatprep.subr.bf16.mxu0 %v4297_v56 }
 0x116   :  { %2542 = vmatpush1.bf16.msra.mxu1 %v4268_v55 }
 0x117   :  { %2543 = vmatprep.subr.bf16.mxu1 %v4276_v11 }
 0x118   :  { %2466 = vmatpush1.bf16.msra.mxu0 %v4295_v60 }
 0x119   :  { %2467 = vmatprep.subr.bf16.mxu0 %v4303_v62 }
 0x11a   :  { %2544 = vmatpush1.bf16.msra.mxu1 %v4274_v61 }
 0x11b   :  { %2545 = vmatprep.subr.bf16.mxu1 %v4282_v63 }
 0x11c   :  { %2468 = vmatpush1.bf16.msra.mxu0 %v4301_v1 }
 0x11d   :  { %2469 = vmatprep.subr.bf16.mxu0 %v4309_v3  ;;  %v4346_v3 = vld [vmem:[#allocation4 + $0x208] ss:$16 sps:$4 sm:$0xff]  }
 0x11e   :  { %2546 = vmatpush1.bf16.msra.mxu1 %v4280_v2  ;;  %v4343_v2 = vld [vmem:[#allocation4 + $0x200] ss:$16 sps:$4 sm:$0xff]  }
 0x11f   :  { %2547 = vmatprep.subr.bf16.mxu1 %v4288_v4  ;;  %v309_v4 = vsub.s32 2, %v4800_v39 }
 0x120   :  { %2470 = vmatpush1.bf16.msra.mxu0 %v4307_v5  ;;  %v4354_v5 = vld [vmem:[#allocation4 + $0x22c] ss:$16 sps:$4 sm:$0xff]  }
 0x121   :  { %2471 = vmatprep.subr.bf16.mxu0 %v4315_v7 }
 0x122   :  { %2548 = vmatpush1.bf16.msra.mxu1 %v4286_v6  ;;  %v313_v6 = vsub.s32 3, %v4800_v39 }
 0x123   :  { %2549 = vmatprep.subr.bf16.mxu1 %v4294_v8  ;;  %v4357_v8 = vld [vmem:[#allocation4 + $0x244] ss:$16 sps:$4 sm:$0xff]  }
 0x124   :  { %2472 = vmatpush1.bf16.msra.mxu0 %v4313_v9  ;;  %v314_v7 = vrot.slane %v297_v41, %v313_v6  ;;  %v4360_v9 = vld [vmem:[#allocation4 + $0x24c] ss:$16 sps:$4 sm:$0xff]  }
 0x125   :  { %2473 = vmatprep.subr.bf16.mxu0 %v4321_v12 }
 0x126   :  { %2550 = vmatpush1.bf16.msra.mxu1 %v4292_v10 }
 0x127   :  { %2551 = vmatprep.subr.bf16.mxu1 %v4300_v13 }
 0x128   :  { %2474 = vmatpush1.bf16.msra.mxu0 %v4319_v14  ;;  %v4355_v14 = vld [vmem:[#allocation4 + $0x240] ss:$16 sps:$4 sm:$0xff]  }
 0x129   :  { %2475 = vmatprep.subr.bf16.mxu0 %v4327_v24 }
 0x12a   :  { %2552 = vmatpush1.bf16.msra.mxu1 %v4298_v15  ;;  %v4358_v15 = vld [vmem:[#allocation4 + $0x248] ss:$16 sps:$4 sm:$0xff]  }
 0x12b   :  { %2553 = vmatprep.subr.bf16.mxu1 %v4306_v16 }
 0x12c   :  { %2476 = vmatpush1.bf16.msra.mxu0 %v4325_v26  ;;  %v4364_v26 = vld [vmem:[#allocation4 + $0x268] ss:$16 sps:$4 sm:$0xff]  }
 0x12d   :  { %2477 = vmatprep.subr.bf16.mxu0 %v4333_v28 }
 0x12e   :  { %2554 = vmatpush1.bf16.msra.mxu1 %v4304_v17 }
 0x12f   :  { %2555 = vmatprep.subr.bf16.mxu1 %v4312_v18  ;;  %v4363_v18 = vld [vmem:[#allocation4 + $0x264] ss:$16 sps:$4 sm:$0xff]  }
 0x130   :  { %2478 = vmatpush1.bf16.msra.mxu0 %v4331_v30  ;;  %v4369_v30 = vld [vmem:[#allocation4 + $0x284] ss:$16 sps:$4 sm:$0xff]  }
 0x131   :  { %2479 = vmatprep.subr.bf16.mxu0 %v4339_v32 }
 0x132   :  { %2556 = vmatpush1.bf16.msra.mxu1 %v4310_v19  ;;  %v4366_v19 = vld [vmem:[#allocation4 + $0x26c] ss:$16 sps:$4 sm:$0xff]  }
 0x133   :  { %2557 = vmatprep.subr.bf16.mxu1 %v4318_v20 }
 0x134   :  { %2480 = vmatpush1.bf16.msra.mxu0 %v4337_v34  ;;  %v4370_v34 = vld [vmem:[#allocation4 + $0x288] ss:$16 sps:$4 sm:$0xff]  }
 0x135   :  { %2492 = vmatprep.subr.bf16.mxu0 %v4345_v36  ;;  %v4378_v36 = vld [vmem:[#allocation4 + $0x2ac] ss:$16 sps:$4 sm:$0xff]  }
 0x136   :  { %2558 = vmatpush1.bf16.msra.mxu1 %v4316_v21 }
 0x137   :  { %2559 = vmatprep.subr.bf16.mxu1 %v4324_v22 }
 0x13a   :  { %2560 = vmatpush1.bf16.msra.mxu1 %v4322_v23 }
 0x13b   :  { %2561 = vmatprep.subr.bf16.mxu1 %v4330_v25  ;;  %v4361_v25 = vld [vmem:[#allocation4 + $0x260] ss:$16 sps:$4 sm:$0xff]  }
 0x13e   :  { %2562 = vmatpush1.bf16.msra.mxu1 %v4328_v27 }
 0x13f   :  { %2563 = vmatprep.subr.bf16.mxu1 %v4336_v29 }
 0x142   :  { %2564 = vmatpush1.bf16.msra.mxu1 %v4334_v31  ;;  %v4372_v31 = vld [vmem:[#allocation4 + $0x28c] ss:$16 sps:$4 sm:$0xff]  }
 0x143   :  { %2565 = vmatprep.subr.bf16.mxu1 %v4342_v33  ;;  %v4367_v33 = vld [vmem:[#allocation4 + $0x280] ss:$16 sps:$4 sm:$0xff]  }
 0x146   :  { %2566 = vmatpush1.bf16.msra.mxu1 %v4340_v35  ;;  %v4375_v35 = vld [vmem:[#allocation4 + $0x2a4] ss:$16 sps:$4 sm:$0xff]  }
 0x147   :  { %2578 = vmatprep.subr.bf16.mxu1 %v4348_v37  ;;  %v4373_v37 = vld [vmem:[#allocation4 + $0x2a0] ss:$16 sps:$4 sm:$0xff]  }
 0x1ca   :  { %v1423_v45 = vpop.f32.mrb[0].mxu0 }
 0x1cb   :  { %v3887_v46 = vadd.f32 %v1423_v45, %v302_v43  ;;  %v1425_v47 = vpop.f32.mrb[1].mxu0  ;;  %v4382_v45 = vld [vmem:[#allocation4 + $0x2c8] ss:$16 sps:$4 sm:$0xff]  }
 0x1cc   :  { %v3889_v48 = vadd.f32 %v1425_v47, %v306_v44  ;;  %v1427_v49 = vpop.f32.mrb[2].mxu0  ;;  %v4390_v47 = vld [vmem:[#allocation4 + $0x2ec] ss:$16 sps:$4 sm:$0xff]  }
 0x1cd   :  { %v3888_v0 = vadd.f32 %v3887_v46, %v4792_v54  ;;  %v3891_v50 = vadd.f32 %v1427_v49, %v302_v43  ;;  %v1429_v51 = vpop.f32.mrb[3].mxu0  ;;  %v4351_v54 = vld [vmem:[#allocation4 + $0x224] ss:$16 sps:$4 sm:$0xff]   ;;  %v4384_v43 = vld [vmem:[#allocation4 + $0x2cc] ss:$16 sps:$4 sm:$0xff]  }
 0x1ce   :  { %v3890_v52 = vadd.f32 %v3889_v48, %v4794_v57  ;;  %v3893_v53 = vadd.f32 %v1429_v51, %v306_v44  ;;  %v310_v57 = vrot.slane %v297_v41, %v309_v4  ;;  %v4381_v41 = vld [vmem:[#allocation4 + $0x2c4] ss:$16 sps:$4 sm:$0xff]   ;;  %v4379_v44 = vld [vmem:[#allocation4 + $0x2c0] ss:$16 sps:$4 sm:$0xff]   ;;  %v4388_v49 = vld [vmem:[#allocation4 + $0x2e8] ss:$16 sps:$4 sm:$0xff]  }
 0x1cf   :  { %v3892_v55 = vadd.f32 %v3891_v50, %v4796_v58  ;;  %v1647_v11 = vmax.f32 %v3888_v0, 0.0  ;;  %v4349_v58 = vld [vmem:[#allocation4 + $0x220] ss:$16 sps:$4 sm:$0xff]   ;;  %v4387_v46 = vld [vmem:[#allocation4 + $0x2e4] ss:$16 sps:$4 sm:$0xff]  }
 0x1d0   :  { %v3894_v56 = vadd.f32 %v3893_v53, %v4798_v59  ;;  %v1648_v61 = vmax.f32 %v3890_v52, 0.0  ;;  %v4352_v59 = vld [vmem:[#allocation4 + $0x228] ss:$16 sps:$4 sm:$0xff]   ;;  %v4385_v48 = vld [vmem:[#allocation4 + $0x2e0] ss:$16 sps:$4 sm:$0xff]  }
 0x1d1   :  { %v1651_v60 = vmax.f32 %v3892_v55, 0.0  ;;  %v4393_v0 = vld [vmem:[#allocation4 + $0x304] ss:$16 sps:$4 sm:$0xff]   ;;  %v4396_v50 = vld [vmem:[#allocation4 + $0x30c] ss:$16 sps:$4 sm:$0xff]  }
 0x1d2   :  { %v1652_v62 = vmax.f32 %v3894_v56, 0.0  ;;  %v4391_v51 = vld [vmem:[#allocation4 + $0x300] ss:$16 sps:$4 sm:$0xff]   ;;  %v4394_v52 = vld [vmem:[#allocation4 + $0x308] ss:$16 sps:$4 sm:$0xff]  }
 0x1d3   :  { %v1655_v63 = vpack.c.bf16 %v1651_v60, %v1647_v11  ;;  %v4399_v53 = vld [vmem:[#allocation4 + $0x324] ss:$16 sps:$4 sm:$0xff]   ;;  %v4402_v55 = vld [vmem:[#allocation4 + $0x32c] ss:$16 sps:$4 sm:$0xff]   ;;  %v4397_v56 = vld [vmem:[#allocation4 + $0x320] ss:$16 sps:$4 sm:$0xff]  }
 0x1d4   :  { %v1656_v1 = vpack.c.bf16 %v1652_v62, %v1648_v61  ;;  %v4400_v11 = vld [vmem:[#allocation4 + $0x328] ss:$16 sps:$4 sm:$0xff]   ;;  %v4405_v60 = vld [vmem:[#allocation4 + $0x344] ss:$16 sps:$4 sm:$0xff]   ;;  %v4408_v61 = vld [vmem:[#allocation4 + $0x34c] ss:$16 sps:$4 sm:$0xff]  }
 0x1d5   :  { %v4403_v62 = vld [vmem:[#allocation4 + $0x340] ss:$16 sps:$4 sm:$0xff]  }
 0x1d6   :  { %2481 = vmatprep.mubr.bf16.mxu0 %v1656_v1  ;;  %2567 = vmatprep.mubr.bf16.mxu1 %v1656_v1  ;;  %v4411_v1 = vld [vmem:[#allocation4 + $0x364] ss:$16 sps:$4 sm:$0xff]  }
 0x1d7   :  { %2482 = vmatmul.mubr.bf16.vlgmr.msra.gmra.mrb[4].mxu0 %v1655_v63  ;;  %2568 = vmatmul.mubr.bf16.vlgmr.msra.gmra.mrb[8].mxu1 %v1655_v63  ;;  %v4406_v63 = vld [vmem:[#allocation4 + $0x348] ss:$16 sps:$4 sm:$0xff]  }
 0x1d8   :  { %2493 = vmatpush1.bf16.msra.mxu0 %v4343_v2  ;;  %2579 = vmatpush1.bf16.msra.mxu1 %v4346_v3  ;;  %v4414_v2 = vld [vmem:[#allocation4 + $0x36c] ss:$16 sps:$4 sm:$0xff]   ;;  %v4409_v3 = vld [vmem:[#allocation4 + $0x360] ss:$16 sps:$4 sm:$0xff]  }
 0x1d9   :  { %2494 = vmatprep.subr.bf16.mxu0 %v4351_v54  ;;  %2580 = vmatprep.subr.bf16.mxu1 %v4354_v5  ;;  %v4412_v54 = vld [vmem:[#allocation4 + $0x368] ss:$16 sps:$4 sm:$0xff]   ;;  %v4417_v5 = vld [vmem:[#allocation4 + $0x384] ss:$16 sps:$4 sm:$0xff]  }
 0x1dc   :  { %v1638_v10 = vpop.f32.mrb[4].mxu1  ;;  %2495 = vmatpush1.bf16.msra.mxu0 %v4349_v58  ;;  %2581 = vmatpush1.bf16.msra.mxu1 %v4352_v59  ;;  %v4415_v58 = vld [vmem:[#allocation4 + $0x380] ss:$16 sps:$4 sm:$0xff]   ;;  %v4418_v59 = vld [vmem:[#allocation4 + $0x388] ss:$16 sps:$4 sm:$0xff]  }
 0x1dd   :  { %v3895_v12 = vadd.f32 %v1638_v10, %v310_v57  ;;  %v1640_v13 = vpop.f32.mrb[5].mxu1  ;;  %2496 = vmatprep.subr.bf16.mxu0 %v4357_v8  ;;  %2582 = vmatprep.subr.bf16.mxu1 %v4360_v9  ;;  %v4426_v8 = vld [vmem:[#allocation4 + $0x3ac] ss:$16 sps:$4 sm:$0xff]   ;;  %v4421_v9 = vld [vmem:[#allocation4 + $0x3a0] ss:$16 sps:$4 sm:$0xff]  }
 0x1de   :  { %v3896_v16 = vadd.f32 %v1640_v13, %v314_v7  ;;  %v1642_v17 = vpop.f32.mrb[6].mxu1  ;;  %v4424_v10 = vld [vmem:[#allocation4 + $0x3a8] ss:$16 sps:$4 sm:$0xff]   ;;  %v4432_v13 = vld [vmem:[#allocation4 + $0x3cc] ss:$16 sps:$4 sm:$0xff]  }
 0x1df   :  { %v3897_v20 = vadd.f32 %v1642_v17, %v310_v57  ;;  %v1644_v21 = vpop.f32.mrb[7].mxu1  ;;  %v1649_v23 = vmax.f32 %v3895_v12, 0.0  ;;  %v4420_v57 = vld [vmem:[#allocation4 + $0x38c] ss:$16 sps:$4 sm:$0xff]   ;;  %v4429_v12 = vld [vmem:[#allocation4 + $0x3c4] ss:$16 sps:$4 sm:$0xff]  }
 0x1e0   :  { %v3898_v22 = vadd.f32 %v1644_v21, %v314_v7  ;;  %2497 = vmatpush1.bf16.msra.mxu0 %v4355_v14  ;;  %2583 = vmatpush1.bf16.msra.mxu1 %v4358_v15  ;;  %v1650_v27 = vmax.f32 %v3896_v16, 0.0  ;;  %v4423_v7 = vld [vmem:[#allocation4 + $0x3a4] ss:$16 sps:$4 sm:$0xff]   ;;  %v4427_v14 = vld [vmem:[#allocation4 + $0x3c0] ss:$16 sps:$4 sm:$0xff]  }
 0x1e1   :  { %v1653_v24 = vmax.f32 %v3897_v20, 0.0  ;;  %2498 = vmatprep.subr.bf16.mxu0 %v4363_v18  ;;  %2584 = vmatprep.subr.bf16.mxu1 %v4366_v19  ;;  %v4430_v15 = vld [vmem:[#allocation4 + $0x3c8] ss:$16 sps:$4 sm:$0xff]   ;;  %v4435_v16 = vld [vmem:[#allocation4 + $0x3e4] ss:$16 sps:$4 sm:$0xff]  }
 0x1e2   :  { %v1654_v28 = vmax.f32 %v3898_v22, 0.0  ;;  %v4438_v17 = vld [vmem:[#allocation4 + $0x3ec] ss:$16 sps:$4 sm:$0xff]   ;;  %v4433_v18 = vld [vmem:[#allocation4 + $0x3e0] ss:$16 sps:$4 sm:$0xff]  }
 0x1e3   :  { %v4823_v29 = vpack.c.bf16 %v1653_v24, %v1649_v23  ;;  %v4436_v19 = vld [vmem:[#allocation4 + $0x3e8] ss:$16 sps:$4 sm:$0xff]   ;;  %v4441_v20 = vld [vmem:[#allocation6 + $0x4] ss:$8 sps:$4 sm:$0xff]   ;;  %v4444_v22 = vld [vmem:[#allocation6 + $0x14] ss:$8 sps:$4 sm:$0xff]  }
 0x1e4   :  { %v1658_v32 = vpack.c.bf16 %v1654_v28, %v1650_v27  ;;  %2499 = vmatpush1.bf16.msra.mxu0 %v4361_v25  ;;  %2585 = vmatpush1.bf16.msra.mxu1 %v4364_v26  ;;  %v4439_v21 = vld [vmem:[#allocation6] ss:$8 sps:$4 sm:$0xff]   ;;  %v4442_v23 = vld [vmem:[#allocation6 + $0x10] ss:$8 sps:$4 sm:$0xff]   ;;  %v4447_v24 = vld [vmem:[#allocation6 + $0x24] ss:$8 sps:$4 sm:$0xff]  }
 0x1e5   :  { %2500 = vmatprep.subr.bf16.mxu0 %v4369_v30  ;;  %2586 = vmatprep.subr.bf16.mxu1 %v4372_v31  ;;  %v4445_v25 = vld [vmem:[#allocation6 + $0x20] ss:$8 sps:$4 sm:$0xff]   ;;  %v4450_v26 = vld [vmem:[#allocation6 + $0x34] ss:$8 sps:$4 sm:$0xff]   ;;  %v4448_v27 = vld [vmem:[#allocation6 + $0x30] ss:$8 sps:$4 sm:$0xff]  }
 0x1e6   :  { %2524 = vmatprep.mubr.bf16.mxu0 %v1658_v32  ;;  %2610 = vmatprep.mubr.bf16.mxu1 %v1658_v32  ;;  %v4453_v28 = vld [vmem:[#allocation6 + $0x44] ss:$8 sps:$4 sm:$0xff]   ;;  %v4451_v30 = vld [vmem:[#allocation6 + $0x40] ss:$8 sps:$4 sm:$0xff]   ;;  %v4456_v31 = vld [vmem:[#allocation6 + $0x54] ss:$8 sps:$4 sm:$0xff]  }
 0x1e7   :  { %v4454_v32 = vld [vmem:[#allocation6 + $0x50] ss:$8 sps:$4 sm:$0xff]  }
 0x1e8   :  { %2501 = vmatpush1.bf16.msra.mxu0 %v4367_v33  ;;  %2587 = vmatpush1.bf16.msra.mxu1 %v4370_v34  ;;  %v4457_v33 = vld [vmem:[#allocation6 + $0x60] ss:$8 sps:$4 sm:$0xff]   ;;  %v4462_v34 = vld [vmem:[#allocation6 + $0x74] ss:$8 sps:$4 sm:$0xff]  }
 0x1e9   :  { %2502 = vmatprep.subr.bf16.mxu0 %v4375_v35  ;;  %2588 = vmatprep.subr.bf16.mxu1 %v4378_v36  ;;  %v4460_v35 = vld [vmem:[#allocation6 + $0x70] ss:$8 sps:$4 sm:$0xff]   ;;  %v4465_v36 = vld [vmem:[#allocation6 + $0x84] ss:$8 sps:$4 sm:$0xff]  }
 0x1ec   :  { %2503 = vmatpush1.bf16.msra.mxu0 %v4373_v37  ;;  %2589 = vmatpush1.bf16.msra.mxu1 %v4376_v38  ;;  %v4463_v37 = vld [vmem:[#allocation6 + $0x80] ss:$8 sps:$4 sm:$0xff]   ;;  %v4468_v38 = vld [vmem:[#allocation6 + $0x94] ss:$8 sps:$4 sm:$0xff]  }
 0x1ed   :  { %2504 = vmatprep.subr.bf16.mxu0 %v4381_v41  ;;  %2590 = vmatprep.subr.bf16.mxu1 %v4384_v43  ;;  %v4466_v41 = vld [vmem:[#allocation6 + $0x90] ss:$8 sps:$4 sm:$0xff]   ;;  %v4471_v43 = vld [vmem:[#allocation6 + $0xa4] ss:$8 sps:$4 sm:$0xff]  }
 0x1f0   :  { %2505 = vmatpush1.bf16.msra.mxu0 %v4379_v44  ;;  %2591 = vmatpush1.bf16.msra.mxu1 %v4382_v45  ;;  %v4469_v44 = vld [vmem:[#allocation6 + $0xa0] ss:$8 sps:$4 sm:$0xff]   ;;  %v4474_v45 = vld [vmem:[#allocation6 + $0xb4] ss:$8 sps:$4 sm:$0xff]  }
 0x1f1   :  { %2506 = vmatprep.subr.bf16.mxu0 %v4387_v46  ;;  %2592 = vmatprep.subr.bf16.mxu1 %v4390_v47  ;;  %v4472_v46 = vld [vmem:[#allocation6 + $0xb0] ss:$8 sps:$4 sm:$0xff]   ;;  %v4477_v47 = vld [vmem:[#allocation6 + $0xc4] ss:$8 sps:$4 sm:$0xff]  }
 0x1f4   :  { %2507 = vmatpush1.bf16.msra.mxu0 %v4385_v48  ;;  %2593 = vmatpush1.bf16.msra.mxu1 %v4388_v49  ;;  %v4475_v48 = vld [vmem:[#allocation6 + $0xc0] ss:$8 sps:$4 sm:$0xff]   ;;  %v4480_v49 = vld [vmem:[#allocation6 + $0xd4] ss:$8 sps:$4 sm:$0xff]  }
 0x1f5   :  { %2508 = vmatprep.subr.bf16.mxu0 %v4393_v0  ;;  %2594 = vmatprep.subr.bf16.mxu1 %v4396_v50  ;;  %v4478_v0 = vld [vmem:[#allocation6 + $0xd0] ss:$8 sps:$4 sm:$0xff]   ;;  %v4483_v50 = vld [vmem:[#allocation6 + $0xe4] ss:$8 sps:$4 sm:$0xff]  }
 0x1f8   :  { %2509 = vmatpush1.bf16.msra.mxu0 %v4391_v51  ;;  %2595 = vmatpush1.bf16.msra.mxu1 %v4394_v52  ;;  %v4481_v51 = vld [vmem:[#allocation6 + $0xe0] ss:$8 sps:$4 sm:$0xff]   ;;  %v4486_v52 = vld [vmem:[#allocation6 + $0xf4] ss:$8 sps:$4 sm:$0xff]  }
 0x1f9   :  { %2510 = vmatprep.subr.bf16.mxu0 %v4399_v53  ;;  %2596 = vmatprep.subr.bf16.mxu1 %v4402_v55  ;;  %v4484_v53 = vld [vmem:[#allocation6 + $0xf0] ss:$8 sps:$4 sm:$0xff]   ;;  %v4489_v55 = vld [vmem:[#allocation6 + $0x104] ss:$8 sps:$4 sm:$0xff]  }
 0x1fc   :  { %2511 = vmatpush1.bf16.msra.mxu0 %v4397_v56  ;;  %2597 = vmatpush1.bf16.msra.mxu1 %v4400_v11  ;;  %v4535_v56 = vld [vmem:[%s4935_s7 + $0x40] sm:$0xff]  }
 0x1fd   :  { %2512 = vmatprep.subr.bf16.mxu0 %v4405_v60  ;;  %2598 = vmatprep.subr.bf16.mxu1 %v4408_v61  ;;  %v4536_v11 = vld [vmem:[%s4935_s7] sm:$0xff]   ;;  %v4537_v60 = vld [vmem:[%s4935_s7 + $0x48] sm:$0xff]  }
 0x1fe   :  { %v4538_v61 = vld [vmem:[%s4935_s7 + $0x8] sm:$0xff]  }
 0x200   :  { %2513 = vmatpush1.bf16.msra.mxu0 %v4403_v62  ;;  %2599 = vmatpush1.bf16.msra.mxu1 %v4406_v63  ;;  %v4539_v62 = vld [vmem:[%s4935_s7 + $0x50] sm:$0xff]  }
 0x201   :  { %2514 = vmatprep.subr.bf16.mxu0 %v4411_v1  ;;  %2600 = vmatprep.subr.bf16.mxu1 %v4414_v2  ;;  %v4540_v63 = vld [vmem:[%s4935_s7 + $0x10] sm:$0xff]   ;;  %v4541_v1 = vld [vmem:[%s4935_s7 + $0x58] sm:$0xff]  }
 0x202   :  { %v4542_v2 = vld [vmem:[%s4935_s7 + $0x18] sm:$0xff]  }
 0x204   :  { %2515 = vmatpush1.bf16.msra.mxu0 %v4409_v3  ;;  %2601 = vmatpush1.bf16.msra.mxu1 %v4412_v54  ;;  %v4543_v3 = vld [vmem:[%s4935_s7 + $0x60] sm:$0xff]  }
 0x205   :  { %2516 = vmatprep.subr.bf16.mxu0 %v4417_v5  ;;  %2602 = vmatprep.subr.bf16.mxu1 %v4420_v57  ;;  %v4544_v54 = vld [vmem:[%s4935_s7 + $0x20] sm:$0xff]   ;;  %v4545_v5 = vld [vmem:[%s4935_s7 + $0x68] sm:$0xff]  }
 0x206   :  { %v1787_v57 = vld [vmem:[%s4932_s4] sm:$0xf] }
 0x208   :  { %2517 = vmatpush1.bf16.msra.mxu0 %v4415_v58  ;;  %2603 = vmatpush1.bf16.msra.mxu1 %v4418_v59  ;;  %v1792_v58 = vrot.slane %v1787_v57, %v4803_v40  ;;  %v1800_v59 = vrot.slane %v1787_v57, %v309_v4 }
 0x209   :  { %2518 = vmatprep.subr.bf16.mxu0 %v4423_v7  ;;  %2604 = vmatprep.subr.bf16.mxu1 %v4426_v8  ;;  %v1796_v7 = vrot.slane %v1787_v57, %v4809_v42  ;;  %v1804_v8 = vrot.slane %v1787_v57, %v313_v6  ;;  %v4534_v57 = vld [vmem:[#allocation6 + $0x1f4] ss:$8 sps:$4 sm:$0xff]  }
 0x20c   :  { %2519 = vmatpush1.bf16.msra.mxu0 %v4421_v9  ;;  %2605 = vmatpush1.bf16.msra.mxu1 %v4424_v10 }
 0x20d   :  { %2520 = vmatprep.subr.bf16.mxu0 %v4429_v12  ;;  %2606 = vmatprep.subr.bf16.mxu1 %v4432_v13 }
 0x210   :  { %2521 = vmatpush1.bf16.msra.mxu0 %v4427_v14  ;;  %2607 = vmatpush1.bf16.msra.mxu1 %v4430_v15 }
 0x211   :  { %2522 = vmatprep.subr.bf16.mxu0 %v4435_v16  ;;  %2608 = vmatprep.subr.bf16.mxu1 %v4438_v17 }
 0x214   :  { %2523 = vmatpush1.bf16.msra.mxu0 %v4433_v18  ;;  %2609 = vmatpush1.bf16.msra.mxu1 %v4436_v19 }
 0x215   :  { %3029 = vmatprep.subr.bf16.mxu0 %v4441_v20  ;;  %3836 = vmatprep.subr.bf16.mxu1 %v4535_v56  ;;  %v4514_v56 = vld [vmem:[#allocation6 + $0x190] ss:$8 sps:$4 sm:$0xff]  }
 0x217   :  { %2525 = vmatmul.mubr.bf16.vlgmr.msra.gmra.mrb[4].mxu0 %v4823_v29  ;;  %2611 = vmatmul.mubr.bf16.vlgmr.msra.gmra.mrb[8].mxu1 %v4823_v29  ;;  %v4459_v29 = vld [vmem:[#allocation6 + $0x64] ss:$8 sps:$4 sm:$0xff]  }
 0x218   :  { %3030 = vmatpush1.bf16.msra.mxu0 %v4439_v21  ;;  %3837 = vmatpush3.bf16.msra.mxu1 %v4536_v11  ;;  %v4519_v11 = vld [vmem:[#allocation6 + $0x1a4] ss:$8 sps:$4 sm:$0xff]  }
 0x219   :  { %3031 = vmatprep.subr.bf16.mxu0 %v4444_v22  ;;  %3838 = vmatprep.subr.bf16.mxu1 %v4537_v60  ;;  %v4517_v60 = vld [vmem:[#allocation6 + $0x1a0] ss:$8 sps:$4 sm:$0xff]  }
 0x21c   :  { %3032 = vmatpush1.bf16.msra.mxu0 %v4442_v23  ;;  %3839 = vmatpush3.bf16.msra.mxu1 %v4538_v61  ;;  %v4522_v61 = vld [vmem:[#allocation6 + $0x1b4] ss:$8 sps:$4 sm:$0xff]  }
 0x21d   :  { %3033 = vmatprep.subr.bf16.mxu0 %v4447_v24  ;;  %3840 = vmatprep.subr.bf16.mxu1 %v4539_v62  ;;  %v4520_v62 = vld [vmem:[#allocation6 + $0x1b0] ss:$8 sps:$4 sm:$0xff]  }
 0x220   :  { %3034 = vmatpush1.bf16.msra.mxu0 %v4445_v25  ;;  %3841 = vmatpush3.bf16.msra.mxu1 %v4540_v63  ;;  %v4525_v63 = vld [vmem:[#allocation6 + $0x1c4] ss:$8 sps:$4 sm:$0xff]  }
 0x221   :  { %3035 = vmatprep.subr.bf16.mxu0 %v4450_v26  ;;  %3842 = vmatprep.subr.bf16.mxu1 %v4541_v1  ;;  %v4523_v1 = vld [vmem:[#allocation6 + $0x1c0] ss:$8 sps:$4 sm:$0xff]  }
 0x224   :  { %3036 = vmatpush1.bf16.msra.mxu0 %v4448_v27  ;;  %3843 = vmatpush3.bf16.msra.mxu1 %v4542_v2  ;;  %v4528_v2 = vld [vmem:[#allocation6 + $0x1d4] ss:$8 sps:$4 sm:$0xff]  }
 0x225   :  { %3037 = vmatprep.subr.bf16.mxu0 %v4453_v28  ;;  %3844 = vmatprep.subr.bf16.mxu1 %v4543_v3  ;;  %v4526_v3 = vld [vmem:[#allocation6 + $0x1d0] ss:$8 sps:$4 sm:$0xff]  }
 0x228   :  { %3038 = vmatpush1.bf16.msra.mxu0 %v4451_v30  ;;  %3845 = vmatpush3.bf16.msra.mxu1 %v4544_v54  ;;  %v4531_v54 = vld [vmem:[#allocation6 + $0x1e4] ss:$8 sps:$4 sm:$0xff]  }
 0x229   :  { %3039 = vmatprep.subr.bf16.mxu0 %v4456_v31  ;;  %3846 = vmatprep.subr.bf16.mxu1 %v4545_v5  ;;  %v4529_v5 = vld [vmem:[#allocation6 + $0x1e0] ss:$8 sps:$4 sm:$0xff]  }
 0x22c   :  { %3040 = vmatpush1.bf16.msra.mxu0 %v4454_v32 }
 0x22d   :  { %3041 = vmatprep.subr.bf16.mxu0 %v4459_v29 }
 0x230   :  { %3042 = vmatpush1.bf16.msra.mxu0 %v4457_v33 }
 0x231   :  { %3043 = vmatprep.subr.bf16.mxu0 %v4462_v34 }
 0x234   :  { %3044 = vmatpush1.bf16.msra.mxu0 %v4460_v35  ;;  %v4487_v35 = vld [vmem:[#allocation6 + $0x100] ss:$8 sps:$4 sm:$0xff]  }
 0x235   :  { %3045 = vmatprep.subr.bf16.mxu0 %v4465_v36  ;;  %v4492_v36 = vld [vmem:[#allocation6 + $0x114] ss:$8 sps:$4 sm:$0xff]  }
 0x238   :  { %3046 = vmatpush1.bf16.msra.mxu0 %v4463_v37  ;;  %v4490_v37 = vld [vmem:[#allocation6 + $0x110] ss:$8 sps:$4 sm:$0xff]  }
 0x239   :  { %3047 = vmatprep.subr.bf16.mxu0 %v4468_v38  ;;  %v4495_v38 = vld [vmem:[#allocation6 + $0x124] ss:$8 sps:$4 sm:$0xff]  }
 0x23c   :  { %3048 = vmatpush1.bf16.msra.mxu0 %v4466_v41  ;;  %v4493_v41 = vld [vmem:[#allocation6 + $0x120] ss:$8 sps:$4 sm:$0xff]  }
 0x23d   :  { %3049 = vmatprep.subr.bf16.mxu0 %v4471_v43  ;;  %v4498_v43 = vld [vmem:[#allocation6 + $0x134] ss:$8 sps:$4 sm:$0xff]  }
 0x240   :  { %3050 = vmatpush1.bf16.msra.mxu0 %v4469_v44  ;;  %v4496_v44 = vld [vmem:[#allocation6 + $0x130] ss:$8 sps:$4 sm:$0xff]  }
 0x241   :  { %3051 = vmatprep.subr.bf16.mxu0 %v4474_v45  ;;  %v4501_v45 = vld [vmem:[#allocation6 + $0x144] ss:$8 sps:$4 sm:$0xff]  }
 0x244   :  { %3052 = vmatpush1.bf16.msra.mxu0 %v4472_v46  ;;  %v4499_v46 = vld [vmem:[#allocation6 + $0x140] ss:$8 sps:$4 sm:$0xff]  }
 0x245   :  { %3053 = vmatprep.subr.bf16.mxu0 %v4477_v47  ;;  %v4504_v47 = vld [vmem:[#allocation6 + $0x154] ss:$8 sps:$4 sm:$0xff]  }
 0x248   :  { %3054 = vmatpush1.bf16.msra.mxu0 %v4475_v48  ;;  %v4502_v48 = vld [vmem:[#allocation6 + $0x150] ss:$8 sps:$4 sm:$0xff]  }
 0x249   :  { %3055 = vmatprep.subr.bf16.mxu0 %v4480_v49  ;;  %v4507_v49 = vld [vmem:[#allocation6 + $0x164] ss:$8 sps:$4 sm:$0xff]  }
 0x24c   :  { %3056 = vmatpush1.bf16.msra.mxu0 %v4478_v0  ;;  %v4505_v0 = vld [vmem:[#allocation6 + $0x160] ss:$8 sps:$4 sm:$0xff]  }
 0x24d   :  { %3057 = vmatprep.subr.bf16.mxu0 %v4483_v50  ;;  %v4510_v50 = vld [vmem:[#allocation6 + $0x174] ss:$8 sps:$4 sm:$0xff]  }
 0x250   :  { %3058 = vmatpush1.bf16.msra.mxu0 %v4481_v51  ;;  %v4508_v51 = vld [vmem:[#allocation6 + $0x170] ss:$8 sps:$4 sm:$0xff]  }
 0x251   :  { %3059 = vmatprep.subr.bf16.mxu0 %v4486_v52  ;;  %v4513_v52 = vld [vmem:[#allocation6 + $0x184] ss:$8 sps:$4 sm:$0xff]  }
 0x254   :  { %3060 = vmatpush1.bf16.msra.mxu0 %v4484_v53  ;;  %v4511_v53 = vld [vmem:[#allocation6 + $0x180] ss:$8 sps:$4 sm:$0xff]  }
 0x255   :  { %3072 = vmatprep.subr.bf16.mxu0 %v4489_v55  ;;  %v4516_v55 = vld [vmem:[#allocation6 + $0x194] ss:$8 sps:$4 sm:$0xff]  }
 0x2ea   :  { %v2526_v9 = vpop.f32.mrb[4].mxu0  ;;  %v2612_v10 = vpop.f32.mrb[8].mxu1 }
 0x2eb   :  { %v3899_v12 = vadd.f32 %v2526_v9, %v1792_v58  ;;  %v3903_v13 = vadd.f32 %v2612_v10, %v1800_v59  ;;  %v2528_v14 = vpop.f32.mrb[5].mxu0  ;;  %v2614_v15 = vpop.f32.mrb[9].mxu1  ;;  %v4549_v9 = vld [vmem:[%s4935_s7 + $0x78] sm:$0xff]  }
 0x2ec   :  { %v3900_v16 = vadd.f32 %v2528_v14, %v1796_v7  ;;  %v3904_v17 = vadd.f32 %v2614_v15, %v1804_v8  ;;  %v2530_v18 = vpop.f32.mrb[6].mxu0  ;;  %v2616_v19 = vpop.f32.mrb[10].mxu1  ;;  %v4550_v10 = vld [vmem:[%s4935_s7 + $0x38] sm:$0xff]  }
 0x2ed   :  { %v3901_v20 = vadd.f32 %v2530_v18, %v1792_v58  ;;  %v3905_v21 = vadd.f32 %v2616_v19, %v1800_v59  ;;  %v2532_v22 = vpop.f32.mrb[7].mxu0  ;;  %v2618_v23 = vpop.f32.mrb[11].mxu1  ;;  %v2621_v25 = vmax.f32 %v3899_v12, 0.0  ;;  %v2623_v26 = vmax.f32 %v3903_v13, 0.0  ;;  %v4532_v58 = vld [vmem:[#allocation6 + $0x1f0] ss:$8 sps:$4 sm:$0xff]  }
 0x2ee   :  { %v3902_v4 = vadd.f32 %v2532_v22, %v1796_v7  ;;  %v3906_v24 = vadd.f32 %v2618_v23, %v1804_v8  ;;  %v2622_v27 = vmax.f32 %v3900_v16, 0.0  ;;  %v2624_v28 = vmax.f32 %v3904_v17, 0.0  ;;  %v4546_v59 = vld [vmem:[%s4935_s7 + $0x28] sm:$0xff]   ;;  %v4547_v7 = vld [vmem:[%s4935_s7 + $0x70] sm:$0xff]   ;;  %v2697_v13 = vld [vmem:[%s4934_s6] sm:$0x3] }
 0x2ef   :  { %v2625_v39 = vmax.f32 %v3901_v20, 0.0  ;;  %v2627_v6 = vmax.f32 %v3905_v21, 0.0  ;;  %3847 = vmatpush3.bf16.msra.mxu1 %v4546_v59  ;;  %v4548_v8 = vld [vmem:[%s4935_s7 + $0x30] sm:$0xff]   ;;  %v4637_v12 = vmov 0.0   ;;  %v2702_v14 = vrot.slane %v2697_v13, %v4803_v40  ;;  %v4551_v40 = vld [vmem:[%s4937_s9] sm:$0xff]  }
 0x2f0   :  { %v2626_v30 = vmax.f32 %v3902_v4, 0.0  ;;  %v2628_v31 = vmax.f32 %v3906_v24, 0.0  ;;  %3848 = vmatprep.subr.bf16.mxu1 %v4547_v7  ;;  %v2706_v15 = vrot.slane %v2697_v13, %v4809_v42  ;;  %v4552_v42 = vld [vmem:[%s4937_s9 + $0x8] sm:$0xff]  }
 0x2f1   :  { %v2629_v32 = vpack.c.bf16 %v2625_v39, %v2621_v25  ;;  %v4869_v29 = vpack.c.bf16 %v2627_v6, %v2623_v26 }
 0x2f2   :  { %v2630_v33 = vpack.c.bf16 %v2626_v30, %v2622_v27  ;;  %v2632_v34 = vpack.c.bf16 %v2628_v31, %v2624_v28  ;;  %v4553_v27 = vld [vmem:[%s4937_s9 + $0x10] sm:$0xff]   ;;  %v4554_v28 = vld [vmem:[%s4937_s9 + $0x18] sm:$0xff]   ;;  %v4555_v30 = vld [vmem:[%s4937_s9 + $0x20] sm:$0xff]  }
 0x2f3   :  { %3849 = vmatpush3.bf16.msra.mxu1 %v4548_v8  ;;  %v4556_v31 = vld [vmem:[%s4937_s9 + $0x28] sm:$0xff]  }
 0x2f4   :  { %3061 = vmatprep.mubr.bf16.mxu0 %v2630_v33  ;;  %3850 = vmatprep.subr.bf16.mxu1 %v4549_v9 }
 0x2f5   :  { %3062 = vmatmul.mubr.bf16.vlgmr.msra.gmra.mrb[8].mxu0 %v2629_v32  ;;  %v4557_v32 = vld [vmem:[%s4937_s9 + $0x30] sm:$0xff]  }
 0x2f6   :  { %3073 = vmatpush1.bf16.msra.mxu0 %v4487_v35  ;;  %3104 = vmatprep.mubr.bf16.mxu0 %v2632_v34  ;;  %v3810_v34 = vld [vmem:[%s4936_s8] ss:$0 sm:$0xff] }
 0x2f7   :  { %3074 = vmatprep.subr.bf16.mxu0 %v4492_v36  ;;  %3851 = vmatpush3.bf16.msra.mxu1 %v4550_v10 }
 0x2f8   :  { %3867 = vmatprep.subr.bf16.mxu1 %v4637_v12 }
 0x2fa   :  { %3075 = vmatpush1.bf16.msra.mxu0 %v4490_v37 }
 0x2fb   :  { %3076 = vmatprep.subr.bf16.mxu0 %v4495_v38 }
 0x2fe   :  { %3077 = vmatpush1.bf16.msra.mxu0 %v4493_v41 }
 0x2ff   :  { %3078 = vmatprep.subr.bf16.mxu0 %v4498_v43 }
 0x302   :  { %3079 = vmatpush1.bf16.msra.mxu0 %v4496_v44 }
 0x303   :  { %3080 = vmatprep.subr.bf16.mxu0 %v4501_v45 }
 0x306   :  { %3081 = vmatpush1.bf16.msra.mxu0 %v4499_v46 }
 0x307   :  { %3082 = vmatprep.subr.bf16.mxu0 %v4504_v47 }
 0x30a   :  { %3083 = vmatpush1.bf16.msra.mxu0 %v4502_v48  ;;  %v3827_v48 = vld [vmem:[%s4938_s10] ss:$0 sm:$0xff] }
 0x30b   :  { %3084 = vmatprep.subr.bf16.mxu0 %v4507_v49 }
 0x30e   :  { %3085 = vmatpush1.bf16.msra.mxu0 %v4505_v0 }
 0x30f   :  { %3086 = vmatprep.subr.bf16.mxu0 %v4510_v50 }
 0x312   :  { %3087 = vmatpush1.bf16.msra.mxu0 %v4508_v51 }
 0x313   :  { %3088 = vmatprep.subr.bf16.mxu0 %v4513_v52 }
 0x316   :  { %3089 = vmatpush1.bf16.msra.mxu0 %v4511_v53 }
 0x317   :  { %3090 = vmatprep.subr.bf16.mxu0 %v4516_v55 }
 0x31a   :  { %3091 = vmatpush1.bf16.msra.mxu0 %v4514_v56 }
 0x31b   :  { %3092 = vmatprep.subr.bf16.mxu0 %v4519_v11 }
 0x31e   :  { %3093 = vmatpush1.bf16.msra.mxu0 %v4517_v60 }
 0x31f   :  { %3094 = vmatprep.subr.bf16.mxu0 %v4522_v61 }
 0x322   :  { %3095 = vmatpush1.bf16.msra.mxu0 %v4520_v62 }
 0x323   :  { %3096 = vmatprep.subr.bf16.mxu0 %v4525_v63 }
 0x326   :  { %3097 = vmatpush1.bf16.msra.mxu0 %v4523_v1 }
 0x327   :  { %3098 = vmatprep.subr.bf16.mxu0 %v4528_v2 }
 0x32a   :  { %3099 = vmatpush1.bf16.msra.mxu0 %v4526_v3 }
 0x32b   :  { %3100 = vmatprep.subr.bf16.mxu0 %v4531_v54 }
 0x32e   :  { %3101 = vmatpush1.bf16.msra.mxu0 %v4529_v5 }
 0x32f   :  { %3102 = vmatprep.subr.bf16.mxu0 %v4534_v57 }
 0x332   :  { %3103 = vmatpush1.bf16.msra.mxu0 %v4532_v58 }
 0x335   :  { %3105 = vmatmul.mubr.bf16.vlgmr.msra.gmra.mrb[8].mxu0 %v4869_v29  ;;  %v4558_v29 = vld [vmem:[%s4937_s9 + $0x38] sm:$0xff]  }
 0x408   :  { %v3106_v16 = vpop.f32.mrb[8].mxu0 }
 0x409   :  { %v3907_v17 = vadd.f32 %v3106_v16, %v2702_v14  ;;  %v3108_v18 = vpop.f32.mrb[9].mxu0 }
 0x40a   :  { %v3908_v19 = vadd.f32 %v3108_v18, %v2706_v15  ;;  %v3110_v20 = vpop.f32.mrb[10].mxu0 }
 0x40b   :  { %v3909_v21 = vadd.f32 %v3110_v20, %v2702_v14  ;;  %v3112_v22 = vpop.f32.mrb[11].mxu0  ;;  %v3115_v4 = vmax.f32 %v3907_v17, 0.0 }
 0x40c   :  { %v3910_v23 = vadd.f32 %v3112_v22, %v2706_v15  ;;  %v3116_v25 = vmax.f32 %v3908_v19, 0.0 }
 0x40d   :  { %v3117_v24 = vmax.f32 %v3909_v21, 0.0 }
 0x40e   :  { %v3118_v26 = vmax.f32 %v3910_v23, 0.0 }
 0x40f   :  { %v3119_v39 = vpack.c.bf16 %v3117_v24, %v3115_v4 }
 0x410   :  { %v3120_v6 = vpack.c.bf16 %v3118_v26, %v3116_v25 }
 0x412   :  { %3288 = vmatprep.mubr.bf16.mxu1 %v3120_v6 }
 0x413   :  { %3289 = vmatmul.mubr.bf16.vlgmr.msra.gmra.mrb[12].mxu1 %v3119_v39 }
 0x414   :  { %3868 = vmatpush3.bf16.msra.mxu1 %v4551_v40  ;;  %3883 = vmatprep.mubr.msk.bf16.mxu1 %vm4638_vm1, %v4637_v12 }
 0x415   :  { %3869 = vmatprep.subr.bf16.mxu1 %v4637_v12 }
 0x418   :  { %3870 = vmatpush3.bf16.msra.mxu1 %v4552_v42 }
 0x419   :  { %3871 = vmatprep.subr.bf16.mxu1 %v4637_v12 }
 0x41c   :  { %3872 = vmatpush3.bf16.msra.mxu1 %v4553_v27 }
 0x41d   :  { %3873 = vmatprep.subr.bf16.mxu1 %v4637_v12 }
 0x420   :  { %3874 = vmatpush3.bf16.msra.mxu1 %v4554_v28 }
 0x421   :  { %3875 = vmatprep.subr.bf16.mxu1 %v4637_v12 }
 0x424   :  { %3876 = vmatpush3.bf16.msra.mxu1 %v4555_v30 }
 0x425   :  { %3877 = vmatprep.subr.bf16.mxu1 %v4637_v12 }
 0x428   :  { %3878 = vmatpush3.bf16.msra.mxu1 %v4556_v31 }
 0x429   :  { %3879 = vmatprep.subr.bf16.mxu1 %v4637_v12 }
 0x42c   :  { %3880 = vmatpush3.bf16.msra.mxu1 %v4557_v32 }
 0x42d   :  { %3881 = vmatprep.subr.bf16.mxu1 %v4637_v12 }
 0x430   :  { %3882 = vmatpush3.bf16.msra.mxu1 %v4558_v29 }
 0x4e6   :  { %v3852_v33 = vpop.f32.mrb[12].mxu1 }
 0x4e7   :  { %v3853_v35 = vpop.f32.mrb[13].mxu1 }
 0x4e8   :  { %v3854_v36 = vadd.f32 %v3853_v35, %v3852_v33  ;;  %v3855_v37 = vpop.f32.mrb[14].mxu1 }
 0x4e9   :  { %v3856_v38 = vpop.f32.mrb[15].mxu1 }
 0x4ea   :  { %v3291_v41 = vadd.f32 %v3854_v36, %v3810_v34  ;;  %v3857_v43 = vadd.f32 %v3856_v38, %v3855_v37 }
 0x4ec   :  { %v3294_v44 = vadd.f32 %v3857_v43, %v3810_v34  ;;  %v3297_v45 = vmax.f32 %v3291_v41, 0.0 }
 0x4ee   :  { %v3298_v46 = vmax.f32 %v3294_v44, 0.0 }
 0x4f0   :  { %v3299_v47 = vpack.c.bf16 %v3298_v46, %v3297_v45 }
 0x4f2   :  { %3884 = vmatmul.mubr.bf16.vlgmr.msra.gmra.mrb[16].mxu1 %v3299_v47 }
 0x5c5   :  { %v3405_v49 = vpop.f32.mrb[16].mxu1 }
 0x5c6   :  { %v3406_v0 = vadd.f32 %v3827_v48, %v3405_v49  ;;  %v3885_v50 = vpop.f32.mrb[17].mxu1 }
 0x5c7   :  { %v3408_v51 = vpop.f32.mrb[18].mxu1 }
 0x5c8   :  { %3412 = vst [vmem:[%s4939_s11] sm:$0xff] %v3406_v0  ;;  %v3409_v52 = vadd.f32 %v3827_v48, %v3408_v51  ;;  %v3886_v53 = vpop.f32.mrb[19].mxu1 }
 0x5ca   :  { %3413 = vst [vmem:[%s4939_s11 + $0x8] sm:$0xff] %v3409_v52 }
 0x5cb   :  { %3418 = vsyncpa [#allocation3], 1 }
 0x5cc   :  { %3419 = vsyncpa [#allocation5], 1 }

</bundles_post_ra>
